<compile_context>
chip_gen: v7x
topology: tpu7x:2x2x1
jax: 0.10.0
libtpu: 0.0.40
codegen_flags: <defaults>
</compile_context>

<pallas_src>
import math
import functools

import jax
import jax.numpy as jnp
from jax.experimental import pallas as pl
from jax.experimental.pallas import tpu as pltpu


# ---------------------------------------------------------------------------
# Fused FFN kernel body.
# Grid = (row tiles, hidden-dim chunks); hidden chunk axis is the reduction.
#   acc[i] += relu(x[i] @ W1[:, k] + b1[k]) @ W2[k, :]
#   on last k: out[i] = acc[i] + b2
# ---------------------------------------------------------------------------
def _ffn_kernel(x_ref, w1_ref, b1_ref, w2_ref, b2_ref, o_ref, acc_ref):
    k = pl.program_id(1)

    @pl.when(k == 0)
    def _():
        acc_ref[...] = jnp.zeros_like(acc_ref)

    x = x_ref[...].astype(jnp.bfloat16)                       # (tm, C)   bf16 (in-kernel cast)
    h = jnp.dot(x, w1_ref[...],
                preferred_element_type=jnp.float32)           # (tm, hk)  f32
    h = jnp.maximum(h + b1_ref[...], 0.0)                     # bias + ReLU
    acc_ref[...] += jnp.dot(h.astype(w2_ref.dtype), w2_ref[...],
                            preferred_element_type=jnp.float32)  # (tm, C) f32

    @pl.when(k == pl.num_programs(1) - 1)
    def _():
        o_ref[...] = (acc_ref[...] + b2_ref[...]).astype(o_ref.dtype)


def feed_forward(x, w1, b1, w2, b2, *, row_tile=128, hidden_tile=512):
    """x: (B, T, C) f32; w1: (C, 4C) bf16; b1: (1, 4C) f32;
    w2: (4C, C) bf16; b2: (1, C) f32. Weights should already be bf16
    (cast once at init, outside the jitted hot path)."""
    B, T, C = x.shape
    Hd = w1.shape[1]
    N = B * T

    tm = row_tile
    hk = hidden_tile if Hd % hidden_tile == 0 else Hd

    # Pad rows to a multiple of the row tile (masked remainder handled by
    # computing garbage rows and slicing them off).
    n_row_tiles = pl.cdiv(N, tm)
    N_pad = n_row_tiles * tm
    x2 = x.reshape(N, C)
    if N_pad != N:
        x2 = jnp.pad(x2, ((0, N_pad - N), (0, 0)))

    out = pl.pallas_call(
        _ffn_kernel,
        out_shape=jax.ShapeDtypeStruct((N_pad, C), jnp.float32),
        grid_spec=pltpu.PrefetchScalarGridSpec(
            num_scalar_prefetch=0,
            grid=(n_row_tiles, Hd // hk),
            in_specs=[
                pl.BlockSpec((tm, C), lambda i, k: (i, 0)),   # x row tile (f32)
                pl.BlockSpec((C, hk), lambda i, k: (0, k)),   # W1 hidden chunk (bf16)
                pl.BlockSpec((1, hk), lambda i, k: (0, k)),   # b1 hidden chunk
                pl.BlockSpec((hk, C), lambda i, k: (k, 0)),   # W2 hidden chunk (bf16)
                pl.BlockSpec((1, C), lambda i, k: (0, 0)),    # b2 (resident)
            ],
            out_specs=pl.BlockSpec((tm, C), lambda i, k: (i, 0)),
            scratch_shapes=[pltpu.VMEM((tm, C), jnp.float32)],
        ),
        compiler_params=pltpu.CompilerParams(
            dimension_semantics=("parallel", "arbitrary")),
    )(x2, w1, b1, w2, b2)

    return out[:N].reshape(B, T, C)


feed_forward_jit = jax.jit(feed_forward,
                           static_argnames=("row_tile", "hidden_tile"))


# ---------------------------------------------------------------------------
# Pure-JAX reference (mirrors the PyTorch module in eval mode, full f32)
# ---------------------------------------------------------------------------
def reference(x, w1, b1, w2, b2):
    h = jnp.maximum(jnp.einsum("btc,ch->bth", x, w1) + b1, 0.0)
    return jnp.einsum("bth,hc->btc", h, w2) + b2


if __name__ == "__main__":
    # Shapes consistent with the module: n_embd = 384, hidden = 4 * n_embd.
    B, T = 2, 64
    n_embd = 384
    hidden = 4 * n_embd

    key = jax.random.PRNGKey(0)
    kx, k1, kb1, k2, kb2 = jax.random.split(key, 5)

    x = jax.random.normal(kx, (B, T, n_embd), dtype=jnp.float32)

    # PyTorch-like nn.Linear init: uniform(-1/sqrt(fan_in), 1/sqrt(fan_in)).
    # Weights are stored pre-transposed as (fan_in, fan_out) so the kernel
    # computes x @ W directly.
    bound1 = 1.0 / math.sqrt(n_embd)
    bound2 = 1.0 / math.sqrt(hidden)
    w1 = jax.random.uniform(k1, (n_embd, hidden),
                            minval=-bound1, maxval=bound1, dtype=jnp.float32)
    b1 = jax.random.uniform(kb1, (1, hidden),
                            minval=-bound1, maxval=bound1, dtype=jnp.float32)
    w2 = jax.random.uniform(k2, (hidden, n_embd),
                            minval=-bound2, maxval=bound2, dtype=jnp.float32)
    b2 = jax.random.uniform(kb2, (1, n_embd),
                            minval=-bound2, maxval=bound2, dtype=jnp.float32)

    # Store MXU weights in bf16 once, outside the jitted hot path (this is
    # the persistent parameter format; no per-call cast ops remain).
    w1_bf16 = w1.astype(jnp.bfloat16)
    w2_bf16 = w2.astype(jnp.bfloat16)

    out = jax.block_until_ready(feed_forward_jit(x, w1_bf16, b1, w2_bf16, b2))
    assert out.shape == (B, T, n_embd)

    ref = reference(x, w1, b1, w2, b2)
    # bf16 MXU operands (f32 accumulation) -> tolerance loosened vs f32 reference.
    assert jnp.allclose(out, ref, atol=5e-2, rtol=5e-2), "mismatch vs reference"

    print("KERNEL_OK")
</pallas_src>

<mosaic_0001>
module attributes {stable_mosaic.version = 11 : i64} {
  func.func @_ffn_kernel(%arg0: i32, %arg1: i32, %arg2: memref<128x384xf32, #tpu.memory_space<vmem>>, %arg3: memref<384x512xbf16, #tpu.memory_space<vmem>>, %arg4: memref<1x512xf32, #tpu.memory_space<vmem>>, %arg5: memref<512x384xbf16, #tpu.memory_space<vmem>>, %arg6: memref<1x384xf32, #tpu.memory_space<vmem>>, %arg7: memref<128x384xf32, #tpu.memory_space<vmem>>, %arg8: memref<128x384xf32, #tpu.memory_space<vmem>>) attributes {dimension_semantics = [#tpu.dimension_semantics<parallel>, #tpu.dimension_semantics<arbitrary>], iteration_bounds = array<i64: 1, 3>, scalar_prefetch = 0 : i64, scratch_operands = 1 : i64, tpu.core_type = #tpu.core_type<tc>, window_params = [{transform_indices = @transform_0, window_bounds = array<i64: 128, 384>}, {transform_indices = @transform_1, window_bounds = array<i64: 384, 512>}, {transform_indices = @transform_2, window_bounds = array<i64: 1, 512>}, {transform_indices = @transform_3, window_bounds = array<i64: 512, 384>}, {pipeline_mode = #tpu.pipeline_mode<synchronous>, transform_indices = @transform_4, window_bounds = array<i64: 1, 384>}, {transform_indices = @transform_5, window_bounds = array<i64: 128, 384>}]} {
    %c0_i32 = arith.constant 0 : i32
    %0 = arith.cmpi eq, %arg1, %c0_i32 : i32
    %1 = arith.extui %0 : i1 to i32
    %c0_i32_0 = arith.constant 0 : i32
    %2 = arith.cmpi ne, %1, %c0_i32_0 : i32
    scf.if %2 {
      %cst_15 = arith.constant 0.000000e+00 : f32
      %21 = vector.broadcast %cst_15 : f32 to vector<128x384xf32>
      %c0_16 = arith.constant 0 : index
      %c0_17 = arith.constant 0 : index
      %22 = vector.load %arg8[%c0_16, %c0_17] : memref<128x384xf32, #tpu.memory_space<vmem>>, vector<128x384xf32>
      tpu.vector_store %arg8[%c0_16, %c0_17], %21 {strides = array<i32>} : memref<128x384xf32, #tpu.memory_space<vmem>>, vector<128x384xf32>,
    } else {
    }
    %c0 = arith.constant 0 : index
    %c0_1 = arith.constant 0 : index
    %3 = vector.load %arg2[%c0, %c0_1] : memref<128x384xf32, #tpu.memory_space<vmem>>, vector<128x384xf32>
    %4 = arith.truncf %3 : vector<128x384xf32> to vector<128x384xbf16>
    %c0_2 = arith.constant 0 : index
    %c0_3 = arith.constant 0 : index
    %5 = vector.load %arg3[%c0_2, %c0_3] : memref<384x512xbf16, #tpu.memory_space<vmem>>, vector<384x512xbf16>
    %cst = arith.constant dense<0.000000e+00> : vector<128x512xf32>
    %6 = tpu.matmul %4, %5, %cst {dimension_numbers = #tpu.dot_dimension_numbers<[1], [0], [0], [1], [0, 0, 1, 1], [], []>} : vector<128x384xbf16>, vector<384x512xbf16>, vector<128x512xf32> -> vector<128x512xf32>
    %c0_4 = arith.constant 0 : index
    %c0_5 = arith.constant 0 : index
    %7 = vector.load %arg4[%c0_4, %c0_5] : memref<1x512xf32, #tpu.memory_space<vmem>>, vector<1x512xf32>
    %8 = vector.broadcast %7 : vector<1x512xf32> to vector<128x512xf32>
    %9 = arith.addf %6, %8 : vector<128x512xf32>
    %cst_6 = arith.constant 0.000000e+00 : f32
    %10 = vector.broadcast %cst_6 : f32 to vector<128x512xf32>
    %11 = arith.maximumf %9, %10 : vector<128x512xf32>
    %c0_7 = arith.constant 0 : index
    %c0_8 = arith.constant 0 : index
    %12 = vector.load %arg8[%c0_7, %c0_8] : memref<128x384xf32, #tpu.memory_space<vmem>>, vector<128x384xf32>
    %13 = arith.truncf %11 : vector<128x512xf32> to vector<128x512xbf16>
    %c0_9 = arith.constant 0 : index
    %c0_10 = arith.constant 0 : index
    %14 = vector.load %arg5[%c0_9, %c0_10] : memref<512x384xbf16, #tpu.memory_space<vmem>>, vector<512x384xbf16>
    %cst_11 = arith.constant dense<0.000000e+00> : vector<128x384xf32>
    %15 = tpu.matmul %13, %14, %cst_11 {dimension_numbers = #tpu.dot_dimension_numbers<[1], [0], [0], [1], [0, 0, 1, 1], [], []>} : vector<128x512xbf16>, vector<512x384xbf16>, vector<128x384xf32> -> vector<128x384xf32>
    %16 = arith.addf %12, %15 : vector<128x384xf32>
    %c0_12 = arith.constant 0 : index
    %c0_13 = arith.constant 0 : index
    %17 = vector.load %arg8[%c0_12, %c0_13] : memref<128x384xf32, #tpu.memory_space<vmem>>, vector<128x384xf32>
    tpu.vector_store %arg8[%c0_12, %c0_13], %16 {strides = array<i32>} : memref<128x384xf32, #tpu.memory_space<vmem>>, vector<128x384xf32>,
    %c2_i32 = arith.constant 2 : i32
    %18 = arith.cmpi eq, %arg1, %c2_i32 : i32
    %19 = arith.extui %18 : i1 to i32
    %c0_i32_14 = arith.constant 0 : i32
    %20 = arith.cmpi ne, %19, %c0_i32_14 : i32
    scf.if %20 {
      %c0_15 = arith.constant 0 : index
      %c0_16 = arith.constant 0 : index
      %21 = vector.load %arg8[%c0_15, %c0_16] : memref<128x384xf32, #tpu.memory_space<vmem>>, vector<128x384xf32>
      %c0_17 = arith.constant 0 : index
      %c0_18 = arith.constant 0 : index
      %22 = vector.load %arg6[%c0_17, %c0_18] : memref<1x384xf32, #tpu.memory_space<vmem>>, vector<1x384xf32>
      %23 = vector.broadcast %22 : vector<1x384xf32> to vector<128x384xf32>
      %24 = arith.addf %21, %23 : vector<128x384xf32>
      %c0_19 = arith.constant 0 : index
      %c0_20 = arith.constant 0 : index
      %25 = vector.load %arg7[%c0_19, %c0_20] : memref<128x384xf32, #tpu.memory_space<vmem>>, vector<128x384xf32>
      tpu.vector_store %arg7[%c0_19, %c0_20], %24 {strides = array<i32>} : memref<128x384xf32, #tpu.memory_space<vmem>>, vector<128x384xf32>,
    } else {
    }
    return
  }
  func.func @transform_0(%arg0: i32, %arg1: i32) -> (i32, i32) {
    %c0_i32 = arith.constant 0 : i32
    %c0_i32_0 = arith.constant 0 : i32
    return %arg0, %c0_i32 : i32, i32
  }
  func.func @transform_1(%arg0: i32, %arg1: i32) -> (i32, i32) {
    %c0_i32 = arith.constant 0 : i32
    %c0_i32_0 = arith.constant 0 : i32
    return %c0_i32, %arg1 : i32, i32
  }
  func.func @transform_2(%arg0: i32, %arg1: i32) -> (i32, i32) {
    %c0_i32 = arith.constant 0 : i32
    %c0_i32_0 = arith.constant 0 : i32
    return %c0_i32, %arg1 : i32, i32
  }
  func.func @transform_3(%arg0: i32, %arg1: i32) -> (i32, i32) {
    %c0_i32 = arith.constant 0 : i32
    %c0_i32_0 = arith.constant 0 : i32
    return %arg1, %c0_i32 : i32, i32
  }
  func.func @transform_4(%arg0: i32, %arg1: i32) -> (i32, i32) {
    %c0_i32 = arith.constant 0 : i32
    %c0_i32_0 = arith.constant 0 : i32
    %c0_i32_1 = arith.constant 0 : i32
    return %c0_i32, %c0_i32_0 : i32, i32
  }
  func.func @transform_5(%arg0: i32, %arg1: i32) -> (i32, i32) {
    %c0_i32 = arith.constant 0 : i32
    %c0_i32_0 = arith.constant 0 : i32
    return %arg0, %c0_i32 : i32, i32
  }
}

</mosaic_0001>

<bundles_post_ra>
// kernel: feed_forward.1
= control target key start
LH: loop header
LB: loop body
LE: loop exit
PB: predicated region body
PF: predicated region fallthrough
CT: control target
= control target key end

     0   :  { %s5067_s0 = inlined_call_operand.hbm [shape: f32[128,384], index: 0, kind: input, shape index: {}]   ;;  %s5068_s1 = inlined_call_operand.hbm [shape: bf16[384,1536], index: 1, kind: input, shape index: {}]   ;;  %s5069_s2 = inlined_call_operand.hbm [shape: f32[1,1536], index: 2, kind: input, shape index: {}]   ;;  %s5070_s3 = inlined_call_operand.hbm [shape: bf16[1536,384], index: 3, kind: input, shape index: {}]   ;;  %s5071_s4 = inlined_call_operand.hbm [shape: f32[1,384], index: 4, kind: input, shape index: {}]   ;;  %s5072_s5 = inlined_call_operand.hbm [shape: f32[128,384], index: 5, kind: output, shape index: {}]  }
   0x1   :  { %5087 = sst [smem:[#allocation21_spill]] %s5068_s1 }
   0x2   :  { %5088 = sst [smem:[#allocation22_spill]] %s5071_s4 }
   0x3   :  { %5089 = sst [smem:[#allocation23_spill]] %s5072_s5 }
   0x4   :  { %10 = vsyncpa [#allocation4], 0 }
   0x5   :  { %11 = vsyncpa [#allocation7], 0 }
   0x6   :  { %13 = vsyncpa [#allocation7 + $0x1], 0 }
   0x7   :  { %14 = vsyncpa [#allocation10], 0 }
   0x8   :  { %16 = vsyncpa [#allocation10 + $0x1], 0 }
   0x9   :  { %17 = vsyncpa [#allocation5], 0  ;;  %s4317_s18 = smov 0   ;;  %s4319_s19 = smov 0  }
   0xa   :  { %s4321_s20 = smov 0   ;;  %s4323_s21 = smov 0  }
   0xb   :  { %s4325_s22 = smov 0   ;;  %s4327_s23 = smov 0  }
   0xc LB: > { %5090 = sst [smem:[#allocation18_spill]] %s4260_s21  ;;  %s4346_s24 = sadd.s32 4294967295, %s4268_s23   ;;  %s4268_s23 = sphi %s4327_s23, %s23_s23   ;;  %s4264_s22 = sphi %s4325_s22, %s5123_s22   ;;  %s4260_s21 = sphi %s4323_s21, %s5122_s21   ;;  %s4256_s20 = sphi %s4321_s20, %s5121_s20   ;;  %s4252_s19 = sphi %s4319_s19, %s5120_s19   ;;  %s4248_s18 = sphi %s4317_s18, %s5119_s18  }
   0xd   : > { %s68_s25 = sadd.s32 1, %s4256_s20  ;;  %p75_p0 = scmp.ne.s32.totalorder %s4256_s20, %s4252_s19 }
   0xe   : > { %p76_p1 = scmp.eq.s32.totalorder %s4268_s23, 0  ;;  %p81_p2 = scmp.ne.s32.totalorder %s4252_s19, %s4248_s18 }
   0xf   : > { %p5073_p3 = scmp.eq.s32.totalorder %s4346_s24, 0  ;;  %p3146_p5 = scmp.ge.s32.totalorder %s4268_s23, 1 }
  0x10   : > { %p77_p4 = por %p76_p1, %p75_p0  ;;  %p191_p7 = scmp.lt.s32.totalorder %s4268_s23, 4 }
  0x11   : > { %p4357_p6 = por %p5073_p3, %p81_p2  ;;  %s4270_s28 = smov [#allocation11]  }
  0x12   : > { %p4362_p8 = pnand %p3146_p5, %p191_p7  ;;  %s221_s29 = sshll.u32 %s4270_s28, 4  ;;  %s222_s29 = int_to_ptr.vmem [resolvable:$true] %s221_s29 }
  0x13   : > { %s5091_s26 = scalar_select %p4357_p6, 1, 0 }
  0x14   : > { %s5092_s27 = scalar_select %p4362_p8, 1, 0 }
  0x15   : > { %p3672_p9 = pneg %p4362_p8  ;;  %p3691_p10 = scmp.lt.s32.totalorder %s4268_s23, 3 }
  0x16   : > { %s5077_s30 = sand.u32 1, %s4268_s23   ;;  %s5095_s4 = sld [smem:[#allocation22_spill]] }
  0x17   : > { %p4372_p11 = pnand %p3672_p9, %p5073_p3  ;;  %p4376_p12 = pnand %p3691_p10, %p77_p4 }
  0x19   : > { %s5093_s6 = scalar_select %p4372_p11, 1, 0 }
  0x1a   : > { %s5094_s7 = scalar_select %p4376_p12, 1, 0 }
  0x1b   : > { %p5078_p0 = pneg %p4372_p11 }
  0x1c   : > { %s4030_s10 = scalar_lea.hbm %s5095_s4, 48 }
  0x1d   : > { %p4031_p13 = scmp.ne.s32.totalorder %s5095_s4, %s4030_s10  ;;  %p4037_p4 = scmp.lt.u32.totalorder %s4030_s10, %s5095_s4 }
  0x1f   : > { %p4033_p1 = pnand %p5078_p0, %p4031_p13 }
  0x21   : > { %p4034_p2 = pneg %p4033_p1 }
  0x23   : > { %p4039_p5 = pnand %p4037_p4, %p4034_p2 }
  0x25   : > { %4042 = shalt.err (!%p4039_p5)
}
  0x26   : > { %s4043_s15 = scalar_lea.vmem %s222_s29, 48  ;;  %s4050_s16 = scalar_lea.vmem %s222_s29, 64 }
  0x27   : > { %p4044_p7 = scmp.ne.s32.totalorder %s222_s29, %s4043_s15  ;;  %p4051_p3 = scmp.lt.s32.totalorder %s222_s29, %s222_s29 }
  0x28   : > { %p4052_p6 = scmp.lt.s32.totalorder %s4050_s16, %s4043_s15 }
  0x29   : > { %p4046_p9 = pnand %p4044_p7, %p5078_p0 }
  0x2a   : > { %p4053_p8 = por %p4052_p6, %p4051_p3 }
  0x2b   : > { %p4047_p10 = pneg %p4046_p9 }
  0x2d   : > { %p4054_p12 = pnand %p4053_p8, %p4047_p10 }
  0x2f   : > { %4057 = shalt.err (!%p4054_p12)
}
  0x30   : > { %3678 = dma.hbm_to_vmem [thread:$0]  (!%p4372_p11), %s5095_s4, 48, %s222_s29, [#allocation10]  }
  0x31   : > { %s32_s28 = sadd.s32 1, %s4264_s22  ;;  %s5081_s8 = sand.u32 1, %s4256_s20  }
  0x32   : > { %p33_p3 = scmp.ge.s32.totalorder %s32_s28, 3  ;;  %s4406_s9 = smul.u32 768, %s5081_s8 }
  0x33   : > { %s3360_s10 = sshll.u32 %s4264_s22, 8  ;;  %s5097_s1 = sld [smem:[#allocation21_spill]] }
  0x34   : > { %s5125_s28 = smov (%p33_p3, %s32_s28), 0  ;;  %s236_s14 = scalar_lea.vmem [#allocation6], %s4406_s9 }
  0x35   : > { %5096 = sst [smem:[#allocation19_spill]] %s5125_s28  ;;  %s65_s29 = ssub.s32 %s4264_s22, %s5125_s28 }
  0x36   : > { %s243_s15 = sshll.u32 %s236_s14, 4  ;;  %p66_p6 = scmp.eq.s32.totalorder %s65_s29, 0  ;;  %s4419_s15 = int_to_ptr.vmem [resolvable:$true] %s243_s15 }
  0x37   : > { %s4428_s17 = scalar_lea.sflag [#allocation7], %s5077_s30  ;;  %p5099_p12 = scmp.ne.s32.totalorder %s5094_s7, 0 }
  0x38   : > { %s4424_s16 = scalar_select %p66_p6, %s4256_s20, %s68_s25  }
  0x39   : > { %s4414_s13 = scalar_lea.hbm %s5097_s1, %s3360_s10  ;;  %p4434_p13 = pneg %p5099_p12 }
  0x3a   : > { %5098 = sst [smem:[#allocation20_spill]] %s4424_s16  ;;  %s4058_s18 = scalar_lea.hbm %s4414_s13, 12288 }
  0x3b   : > { %p4059_p8 = scmp.ne.s32.totalorder %s4414_s13, %s4058_s18  ;;  %s4063_s29 = scalar_lea.hbm %s5097_s1, 36864 }
  0x3c   : > { %s5100_s10 = scalar_select %p4434_p13, 1, 0 }
  0x3d   : > { %p4061_p1 = pnand %p4434_p13, %p4059_p8  ;;  %p4064_p4 = scmp.lt.u32.totalorder %s4414_s13, %s5097_s1 }
  0x3e   : > { %p4065_p5 = scmp.lt.u32.totalorder %s4063_s29, %s4058_s18  ;;  %p4067_p9 = scmp.lt.u32.totalorder %s4058_s18, %s4414_s13 }
  0x3f   : > { %p4062_p2 = pneg %p4061_p1 }
  0x40   : > { %p4066_p7 = por %p4065_p5, %p4064_p4 }
  0x42   : > { %p4068_p10 = por %p4067_p9, %p4066_p7 }
  0x44   : > { %p4069_p3 = pnand %p4068_p10, %p4062_p2 }
  0x46   : > { %4072 = shalt.err (!%p4069_p3)
}
  0x47   : > { %s4073_s30 = scalar_lea.vmem %s4419_s15, 12288  ;;  %s4271_s11 = smov [#allocation6]  }
  0x48   : > { %p4074_p6 = scmp.ne.s32.totalorder %s4419_s15, %s4073_s30  ;;  %s4078_s12 = sshll.u32 %s4271_s11, 4  ;;  %s4079_s12 = int_to_ptr.vmem [resolvable:$false] %s4078_s12 }
  0x49   : > { %s4080_s25 = scalar_lea.vmem %s4079_s12, 24576  ;;  %p4081_p0 = scmp.lt.s32.totalorder %s4419_s15, %s4079_s12 }
  0x4a   : > { %p4076_p8 = pnand %p4074_p6, %p4434_p13  ;;  %p4082_p11 = scmp.lt.s32.totalorder %s4080_s25, %s4073_s30 }
  0x4c   : > { %p4077_p1 = pneg %p4076_p8  ;;  %p4083_p4 = por %p4082_p11, %p4081_p0 }
  0x4e   : > { %p4084_p5 = pnand %p4083_p4, %p4077_p1 }
  0x50   : > { %4087 = shalt.err (!%p4084_p5)
}
  0x51   : > { %s4272_s18 = smov 768   ;;  %s4273_s29 = smov 256  }
  0x52   : > { %s4274_s14 = smov 16   ;;  %s4275_s8 = smov [#allocation3]  }
  0x53   : > { %3682 = dma.hbm_to_vmem [thread:$0]  (!%p5099_p12), %s4414_s13, 12288, %s4419_s15, %s4428_s17, %s4272_s18, %s4273_s29, %s4274_s14  }
  0x54   : > { %s207_s11 = sshll.u32 %s4275_s8, 4  ;;  %s5101_s1 = sand.u32 1, %s4256_s20   ;;  %s208_s11 = int_to_ptr.vmem [resolvable:$true] %s207_s11 }
  0x55   : > { %s3152_s12 = sshll.u32 %s5101_s1, 2  ;;  %s4088_s4 = scalar_lea.hbm %s5067_s0, 6144 }
  0x56   : > { %p4089_p11 = scmp.ne.s32.totalorder %s5067_s0, %s4088_s4  ;;  %p5102_p0 = scmp.ne.s32.totalorder %s5093_s6, 0 }
  0x57   : > { %p4095_p10 = scmp.lt.u32.totalorder %s4088_s4, %s5067_s0 }
  0x58   : > { %p5103_p2 = pneg %p5102_p0 }
  0x5a   : > { %p4091_p7 = pnand %p4089_p11, %p5103_p2 }
  0x5c   : > { %p4092_p9 = pneg %p4091_p7 }
  0x5e   : > { %p4097_p3 = pnand %p4095_p10, %p4092_p9 }
  0x60   : > { %4100 = shalt.err (!%p4097_p3)
}
  0x61   : > { %s4101_s8 = scalar_lea.vmem %s208_s11, 6144  ;;  %p5104_p8 = pmov %p5103_p2 }
  0x62   : > { %p4102_p6 = scmp.ne.s32.totalorder %s208_s11, %s4101_s8  ;;  %p4109_p5 = scmp.lt.s32.totalorder %s208_s11, %s208_s11 }
  0x63   : > { %p4110_p12 = scmp.lt.s32.totalorder %s4101_s8, %s4101_s8 }
  0x64   : > { %p4104_p1 = pnand %p4102_p6, %p5104_p8 }
  0x65   : > { %p4111_p13 = por %p4110_p12, %p4109_p5 }
  0x66   : > { %p4105_p4 = pneg %p4104_p1 }
  0x68   : > { %p4112_p2 = pnand %p4111_p13, %p4105_p4 }
  0x6a   : > { %4115 = shalt.err (!%p4112_p2)
}
  0x6b   : > { %s4276_s1 = smov 384   ;;  %s4277_s5 = smov 24  }
  0x6c   : > { %3675 = dma.hbm_to_vmem [thread:$0]  (!%p5102_p0), %s5067_s0, 6144, %s208_s11, [#allocation4], %s4276_s1, %s4276_s1, %s4277_s5  }
  0x6d   : > { %s3361_s28 = sshll.u32 %s4264_s22, 6  ;;  %s257_s18 = scalar_lea.vmem [#allocation8], %s3152_s12 }
  0x6e   : > { %s4484_s16 = scalar_lea.hbm %s5069_s2, %s3361_s28  ;;  %s265_s29 = sshll.u32 %s257_s18, 4  ;;  %s266_s29 = int_to_ptr.vmem [resolvable:$true] %s265_s29 }
  0x6f   : > { %s4116_s14 = scalar_lea.hbm %s4484_s16, 64  ;;  %p5105_p13 = scmp.ne.s32.totalorder %s5100_s10, 0 }
  0x70   : > { %p4117_p12 = scmp.ne.s32.totalorder %s4484_s16, %s4116_s14  ;;  %s4121_s30 = scalar_lea.hbm %s5069_s2, 192 }
  0x71   : > { %p4122_p0 = scmp.lt.u32.totalorder %s4484_s16, %s5069_s2  ;;  %p4123_p9 = scmp.lt.u32.totalorder %s4121_s30, %s4116_s14 }
  0x72   : > { %p4119_p11 = pnand %p4117_p12, %p5105_p13  ;;  %p4125_p3 = scmp.lt.u32.totalorder %s4116_s14, %s4484_s16 }
  0x73   : > { %p4124_p10 = por %p4123_p9, %p4122_p0 }
  0x74   : > { %p4120_p7 = pneg %p4119_p11 }
  0x75   : > { %p4126_p6 = por %p4125_p3, %p4124_p10 }
  0x77   : > { %p4127_p8 = pnand %p4126_p6, %p4120_p7 }
  0x79   : > { %4130 = shalt.err (!%p4127_p8)
}
  0x7a   : > { %s4131_s12 = scalar_lea.vmem %s266_s29, 64  ;;  %s4278_s1 = smov [#allocation8]  }
  0x7b   : > { %p4132_p1 = scmp.ne.s32.totalorder %s266_s29, %s4131_s12  ;;  %s4136_s5 = sshll.u32 %s4278_s1, 4  ;;  %s4137_s5 = int_to_ptr.vmem [resolvable:$false] %s4136_s5 }
  0x7c   : > { %s4138_s4 = scalar_lea.vmem %s4137_s5, 128  ;;  %p4139_p2 = scmp.lt.s32.totalorder %s266_s29, %s4137_s5 }
  0x7d   : > { %p4134_p4 = pnand %p4132_p1, %p5105_p13  ;;  %p4140_p12 = scmp.lt.s32.totalorder %s4138_s4, %s4131_s12 }
  0x7f   : > { %p4135_p5 = pneg %p4134_p4  ;;  %p4141_p11 = por %p4140_p12, %p4139_p2 }
  0x81   : > { %p4142_p0 = pnand %p4141_p11, %p4135_p5 }
  0x83   : > { %4145 = shalt.err (!%p4142_p0)
}
  0x84   : > { %p5106_p9 = scmp.ne.s32.totalorder %s5094_s7, 0  ;;  %s3652_s21 = smul.u32 12288, %s4264_s22 }
  0x85   : > { %s276_s28 = scalar_lea.vmem [#allocation9], %s4406_s9  ;;  %s5107_s6 = sand.u32 1, %s4268_s23  }
  0x86   : > { %3685 = dma.hbm_to_vmem [thread:$0]  (!%p5106_p9), %s4484_s16, 64, %s266_s29, %s4428_s17  }
  0x87   : > { %s284_s13 = sshll.u32 %s276_s28, 4  ;;  %s4509_s14 = scalar_lea.hbm %s5070_s3, %s3652_s21  ;;  %s4511_s13 = int_to_ptr.vmem [resolvable:$true] %s284_s13 }
  0x88   : > { %s4515_s11 = scalar_lea.sflag [#allocation10], %s5107_s6  ;;  %s4146_s30 = scalar_lea.hbm %s4509_s14, 12288 }
  0x89   : > { %p4147_p7 = scmp.ne.s32.totalorder %s4509_s14, %s4146_s30  ;;  %s4151_s16 = scalar_lea.hbm %s5070_s3, 36864 }
  0x8a   : > { %p4152_p6 = scmp.lt.u32.totalorder %s4509_s14, %s5070_s3  ;;  %p4153_p8 = scmp.lt.u32.totalorder %s4151_s16, %s4146_s30 }
  0x8b   : > { %p4149_p10 = pnand %p4147_p7, %p5105_p13  ;;  %p4155_p4 = scmp.lt.u32.totalorder %s4146_s30, %s4509_s14 }
  0x8c   : > { %p4154_p1 = por %p4153_p8, %p4152_p6 }
  0x8d   : > { %p4150_p3 = pneg %p4149_p10 }
  0x8e   : > { %p4156_p5 = por %p4155_p4, %p4154_p1 }
  0x90   : > { %p4157_p2 = pnand %p4156_p5, %p4150_p3 }
  0x92   : > { %4160 = shalt.err (!%p4157_p2)
}
  0x93   : > { %s4161_s8 = scalar_lea.vmem %s4511_s13, 12288  ;;  %s4279_s12 = smov [#allocation9]  }
  0x94   : > { %p4162_p12 = scmp.ne.s32.totalorder %s4511_s13, %s4161_s8  ;;  %s4166_s1 = sshll.u32 %s4279_s12, 4  ;;  %s4167_s1 = int_to_ptr.vmem [resolvable:$false] %s4166_s1 }
  0x95   : > { %s4168_s5 = scalar_lea.vmem %s4167_s1, 24576  ;;  %p4169_p7 = scmp.lt.s32.totalorder %s4511_s13, %s4167_s1 }
  0x96   : > { %p4164_p11 = pnand %p4162_p12, %p5105_p13  ;;  %p4170_p10 = scmp.lt.s32.totalorder %s4168_s5, %s4161_s8 }
  0x98   : > { %p4165_p0 = pneg %p4164_p11  ;;  %p4171_p6 = por %p4170_p10, %p4169_p7 }
  0x9a   : > { %p4172_p8 = pnand %p4171_p6, %p4165_p0 }
  0x9c   : > { %4175 = shalt.err (!%p4172_p8)
}
  0x9d   : > { %s4280_s4 = smov 192   ;;  %s4281_s21 = smov 12  }
  0x9e   : > { %3688 = dma.hbm_to_vmem [thread:$0]  (!%p5106_p9), %s4509_s14, 12288, %s4511_s13, %s4515_s11, %s4280_s4, %s4280_s4, %s4281_s21  }
  0x9f   : > { %p5108_p13 = scmp.ne.s32.totalorder %s5092_s27, 0 }
  0xa0   : > { %p5109_p3 = scmp.eq.s32.totalorder (!%p5108_p13), %s4346_s24, 0 }
  0xa1   : > { %296 = sbr.rel (%p5108_p13) target bundleno = 956 (0x3bc), region = 40 }
  0xa8   : > { %4227 = dma.done.wait (%p5109_p3), [#allocation4], 6144   ;;  %p5110_p1 = pmov %p5109_p3 }
  0xa9   : > { %s302_s10 = sand.u32 1, %s4346_s24   ;;  %s304_s28 = sand.u32 1, %s4252_s19  }
  0xaa   : > { %4229 = vsyncadd (%p5110_p1), [#allocation4], 4294961152  ;;  %s3653_s15 = smul.u32 768, %s304_s28  ;;  %s303_s18 = scalar_lea.sflag [#allocation7], %s302_s10 }
  0xab   : > { %p5111_p4 = scmp.ne.s32.totalorder %s5091_s26, 0 }
  0xac   : > { %s4547_s6 = scalar_lea.vmem [#allocation6], %s3653_s15 }
  0xad   : > { %4231 = dma.done.wait (%p5111_p4), %s303_s18, 12352  }
  0xae   : > { %4233 = vsyncadd (%p5111_p4), %s303_s18, 4294954944  ;;  %s4553_s27 = sshll.u32 %s304_s28, 2  ;;  %s321_s13 = scalar_lea.sflag [#allocation10], %s302_s10 }
  0xaf   : > { %s315_s7 = scalar_lea.vmem [#allocation8], %s4553_s27  ;;  %s4556_s14 = scalar_lea.vmem [#allocation9], %s3653_s15 }
  0xb0   : > { %4235 = dma.done.wait (%p5111_p4), %s321_s13, 12288  }
  0xb1   : > { %4237 = vsyncadd (%p5111_p4), %s321_s13, 4294955008  ;;  %p5112_p9 = pmov %p5110_p1 }
  0xb2   : > { %p5113_p5 = pmov %p5110_p1 }
  0xb3   : > { %4239 = dma.done.wait (%p5112_p9), [#allocation10], 48  }
  0xb4   : > { %4241 = vsyncadd (%p5113_p5), [#allocation10], 4294967248  ;;  %s5114_s11 = sld [smem:[#allocation18_spill]] }
  0xba   : > { %p3162_p2 = scmp.ne.s32.totalorder %s5114_s11, 0 }
  0xbb   : > { %v4282_v0 = vmov (!%p3162_p2), 0.0  }
  0xbc   : > { %369 = sbr.rel (%p3162_p2) target bundleno = 212 (0xd4), region = 64  ;;  %370 = vst [vmem:[#allocation2] sm:$0xff] (!%p3162_p2), %v4282_v0  ;;  %371 = vst [vmem:[#allocation2 + $0x8] sm:$0xff] (!%p3162_p2), %v4282_v0 }
  0xbd   : > { %372 = vst [vmem:[#allocation2 + $0x10] sm:$0xff] (!%p3162_p2), %v4282_v0  ;;  %373 = vst [vmem:[#allocation2 + $0x18] sm:$0xff] (!%p3162_p2), %v4282_v0 }
  0xbe   : > { %374 = vst [vmem:[#allocation2 + $0x20] sm:$0xff] (!%p3162_p2), %v4282_v0  ;;  %375 = vst [vmem:[#allocation2 + $0x28] sm:$0xff] (!%p3162_p2), %v4282_v0 }
  0xbf   : > { %376 = vst [vmem:[#allocation2 + $0x30] sm:$0xff] (!%p3162_p2), %v4282_v0  ;;  %377 = vst [vmem:[#allocation2 + $0x38] sm:$0xff] (!%p3162_p2), %v4282_v0 }
  0xc0   : > { %378 = vst [vmem:[#allocation2 + $0x40] sm:$0xff] (!%p3162_p2), %v4282_v0  ;;  %379 = vst [vmem:[#allocation2 + $0x48] sm:$0xff] (!%p3162_p2), %v4282_v0 }
  0xc1   : > { %380 = vst [vmem:[#allocation2 + $0x50] sm:$0xff] (!%p3162_p2), %v4282_v0  ;;  %381 = vst [vmem:[#allocation2 + $0x58] sm:$0xff] (!%p3162_p2), %v4282_v0 }
  0xc2   : > { %382 = vst [vmem:[#allocation2 + $0x60] sm:$0xff] (!%p3162_p2), %v4282_v0  ;;  %383 = vst [vmem:[#allocation2 + $0x68] sm:$0xff] (!%p3162_p2), %v4282_v0 }
  0xc3   : > { %384 = vst [vmem:[#allocation2 + $0x70] sm:$0xff] %v4282_v0  ;;  %385 = vst [vmem:[#allocation2 + $0x78] sm:$0xff] %v4282_v0 }
  0xc4   : > { %386 = vst [vmem:[#allocation2 + $0x80] sm:$0xff] %v4282_v0  ;;  %387 = vst [vmem:[#allocation2 + $0x88] sm:$0xff] %v4282_v0 }
  0xc5   : > { %388 = vst [vmem:[#allocation2 + $0x90] sm:$0xff] %v4282_v0  ;;  %389 = vst [vmem:[#allocation2 + $0x98] sm:$0xff] %v4282_v0 }
  0xc6   : > { %390 = vst [vmem:[#allocation2 + $0xa0] sm:$0xff] %v4282_v0  ;;  %391 = vst [vmem:[#allocation2 + $0xa8] sm:$0xff] %v4282_v0 }
  0xc7   : > { %392 = vst [vmem:[#allocation2 + $0xb0] sm:$0xff] %v4282_v0  ;;  %393 = vst [vmem:[#allocation2 + $0xb8] sm:$0xff] %v4282_v0 }
  0xc8   : > { %394 = vst [vmem:[#allocation2 + $0xc0] sm:$0xff] %v4282_v0  ;;  %395 = vst [vmem:[#allocation2 + $0xc8] sm:$0xff] %v4282_v0 }
  0xc9   : > { %396 = vst [vmem:[#allocation2 + $0xd0] sm:$0xff] %v4282_v0  ;;  %397 = vst [vmem:[#allocation2 + $0xd8] sm:$0xff] %v4282_v0 }
  0xca   : > { %398 = vst [vmem:[#allocation2 + $0xe0] sm:$0xff] %v4282_v0  ;;  %399 = vst [vmem:[#allocation2 + $0xe8] sm:$0xff] %v4282_v0 }
  0xcb   : > { %400 = vst [vmem:[#allocation2 + $0xf0] sm:$0xff] %v4282_v0  ;;  %401 = vst [vmem:[#allocation2 + $0xf8] sm:$0xff] %v4282_v0 }
  0xcc   : > { %402 = vst [vmem:[#allocation2 + $0x100] sm:$0xff] %v4282_v0  ;;  %403 = vst [vmem:[#allocation2 + $0x108] sm:$0xff] %v4282_v0 }
  0xcd   : > { %404 = vst [vmem:[#allocation2 + $0x110] sm:$0xff] %v4282_v0  ;;  %405 = vst [vmem:[#allocation2 + $0x118] sm:$0xff] %v4282_v0 }
  0xce   : > { %406 = vst [vmem:[#allocation2 + $0x120] sm:$0xff] %v4282_v0  ;;  %407 = vst [vmem:[#allocation2 + $0x128] sm:$0xff] %v4282_v0 }
  0xcf   : > { %408 = vst [vmem:[#allocation2 + $0x130] sm:$0xff] %v4282_v0  ;;  %409 = vst [vmem:[#allocation2 + $0x138] sm:$0xff] %v4282_v0 }
  0xd0   : > { %410 = vst [vmem:[#allocation2 + $0x140] sm:$0xff] %v4282_v0  ;;  %411 = vst [vmem:[#allocation2 + $0x148] sm:$0xff] %v4282_v0 }
  0xd1   : > { %412 = vst [vmem:[#allocation2 + $0x150] sm:$0xff] %v4282_v0  ;;  %413 = vst [vmem:[#allocation2 + $0x158] sm:$0xff] %v4282_v0 }
  0xd2   : > { %414 = vst [vmem:[#allocation2 + $0x160] sm:$0xff] %v4282_v0  ;;  %415 = vst [vmem:[#allocation2 + $0x168] sm:$0xff] %v4282_v0 }
  0xd3   : > { %416 = vst [vmem:[#allocation2 + $0x170] sm:$0xff] %v4282_v0  ;;  %417 = vst [vmem:[#allocation2 + $0x178] sm:$0xff] %v4282_v0 }
  0xd4 PF: > { %v3758_v1 = vld [vmem:[%s4547_s6 + $0x4] ss:$16 sps:$4 sm:$0xff]   ;;  %v3760_v2 = vld [vmem:[%s4547_s6 + $0xc] ss:$16 sps:$4 sm:$0xff]   ;;  %v3762_v3 = vld [vmem:[%s4547_s6] ss:$16 sps:$4 sm:$0xff]  }
  0xd5   : > { %1088 = vmatprep.subr.bf16.mxu0 %v3758_v1  ;;  %v3763_v4 = vld [vmem:[%s4547_s6 + $0x8] ss:$16 sps:$4 sm:$0xff]   ;;  %1314 = vmatprep.subr.bf16.mxu1 %v3760_v2  ;;  %v3764_v5 = vld [vmem:[%s4547_s6 + $0x24] ss:$16 sps:$4 sm:$0xff]   ;;  %v3766_v6 = vld [vmem:[%s4547_s6 + $0x2c] ss:$16 sps:$4 sm:$0xff]  }
  0xd6   : > { %1089 = vmatpush1.bf16.msra.mxu0 %v3762_v3  ;;  %1315 = vmatpush1.bf16.msra.mxu1 %v3763_v4  ;;  %v3768_v7 = vld [vmem:[%s4547_s6 + $0x20] ss:$16 sps:$4 sm:$0xff]   ;;  %v3769_v8 = vld [vmem:[%s4547_s6 + $0x28] ss:$16 sps:$4 sm:$0xff]   ;;  %v3770_v9 = vld [vmem:[%s4547_s6 + $0x44] ss:$16 sps:$4 sm:$0xff]  }
  0xd7   : > { %1090 = vmatprep.subr.bf16.mxu0 %v3764_v5  ;;  %1316 = vmatprep.subr.bf16.mxu1 %v3766_v6  ;;  %v3772_v10 = vld [vmem:[%s4547_s6 + $0x4c] ss:$16 sps:$4 sm:$0xff]   ;;  %v3774_v11 = vld [vmem:[%s4547_s6 + $0x40] ss:$16 sps:$4 sm:$0xff]   ;;  %v3775_v12 = vld [vmem:[%s4547_s6 + $0x48] ss:$16 sps:$4 sm:$0xff]  }
  0xd8   : > { %v3776_v13 = vld [vmem:[%s4547_s6 + $0x64] ss:$16 sps:$4 sm:$0xff]   ;;  %v3778_v14 = vld [vmem:[%s4547_s6 + $0x6c] ss:$16 sps:$4 sm:$0xff]   ;;  %v3780_v15 = vld [vmem:[%s4547_s6 + $0x60] ss:$16 sps:$4 sm:$0xff]  }
  0xd9   : > { %v3781_v16 = vld [vmem:[%s4547_s6 + $0x68] ss:$16 sps:$4 sm:$0xff]   ;;  %v3782_v17 = vld [vmem:[%s4547_s6 + $0x84] ss:$16 sps:$4 sm:$0xff]   ;;  %v3784_v18 = vld [vmem:[%s4547_s6 + $0x8c] ss:$16 sps:$4 sm:$0xff]  }
  0xda   : > { %1091 = vmatpush1.bf16.msra.mxu0 %v3768_v7  ;;  %1317 = vmatpush1.bf16.msra.mxu1 %v3769_v8  ;;  %v3786_v19 = vld [vmem:[%s4547_s6 + $0x80] ss:$16 sps:$4 sm:$0xff]   ;;  %v3787_v20 = vld [vmem:[%s4547_s6 + $0x88] ss:$16 sps:$4 sm:$0xff]   ;;  %v3788_v21 = vld [vmem:[%s4547_s6 + $0xa4] ss:$16 sps:$4 sm:$0xff]  }
  0xdb   : > { %1092 = vmatprep.subr.bf16.mxu0 %v3770_v9  ;;  %1318 = vmatprep.subr.bf16.mxu1 %v3772_v10  ;;  %v3790_v22 = vld [vmem:[%s4547_s6 + $0xac] ss:$16 sps:$4 sm:$0xff]   ;;  %v3792_v23 = vld [vmem:[%s4547_s6 + $0xa0] ss:$16 sps:$4 sm:$0xff]   ;;  %v3793_v24 = vld [vmem:[%s4547_s6 + $0xa8] ss:$16 sps:$4 sm:$0xff]  }
  0xdc   : > { %v3794_v25 = vld [vmem:[%s4547_s6 + $0xc4] ss:$16 sps:$4 sm:$0xff]   ;;  %v3796_v26 = vld [vmem:[%s4547_s6 + $0xcc] ss:$16 sps:$4 sm:$0xff]   ;;  %v3798_v27 = vld [vmem:[%s4547_s6 + $0xc0] ss:$16 sps:$4 sm:$0xff]  }
  0xdd   : > { %v3799_v28 = vld [vmem:[%s4547_s6 + $0xc8] ss:$16 sps:$4 sm:$0xff]   ;;  %v3800_v29 = vld [vmem:[%s4547_s6 + $0xe4] ss:$16 sps:$4 sm:$0xff]   ;;  %v3802_v30 = vld [vmem:[%s4547_s6 + $0xec] ss:$16 sps:$4 sm:$0xff]  }
  0xde   : > { %1093 = vmatpush1.bf16.msra.mxu0 %v3774_v11  ;;  %1319 = vmatpush1.bf16.msra.mxu1 %v3775_v12  ;;  %v3804_v31 = vld [vmem:[%s4547_s6 + $0xe0] ss:$16 sps:$4 sm:$0xff]   ;;  %v3805_v32 = vld [vmem:[%s4547_s6 + $0xe8] ss:$16 sps:$4 sm:$0xff]   ;;  %v3806_v33 = vld [vmem:[%s4547_s6 + $0x104] ss:$16 sps:$4 sm:$0xff]  }
  0xdf   : > { %1094 = vmatprep.subr.bf16.mxu0 %v3776_v13  ;;  %1320 = vmatprep.subr.bf16.mxu1 %v3778_v14  ;;  %v3808_v34 = vld [vmem:[%s4547_s6 + $0x10c] ss:$16 sps:$4 sm:$0xff]   ;;  %v3810_v35 = vld [vmem:[%s4547_s6 + $0x100] ss:$16 sps:$4 sm:$0xff]   ;;  %v3811_v36 = vld [vmem:[%s4547_s6 + $0x108] ss:$16 sps:$4 sm:$0xff]  }
  0xe0   : > { %v3812_v37 = vld [vmem:[%s4547_s6 + $0x124] ss:$16 sps:$4 sm:$0xff]   ;;  %v3814_v38 = vld [vmem:[%s4547_s6 + $0x12c] ss:$16 sps:$4 sm:$0xff]   ;;  %v3816_v39 = vld [vmem:[%s4547_s6 + $0x120] ss:$16 sps:$4 sm:$0xff]  }
  0xe1   : > { %v3817_v40 = vld [vmem:[%s4547_s6 + $0x128] ss:$16 sps:$4 sm:$0xff]   ;;  %v3818_v41 = vld [vmem:[%s4547_s6 + $0x144] ss:$16 sps:$4 sm:$0xff]   ;;  %v3820_v42 = vld [vmem:[%s4547_s6 + $0x14c] ss:$16 sps:$4 sm:$0xff]  }
  0xe2   : > { %1095 = vmatpush1.bf16.msra.mxu0 %v3780_v15  ;;  %1321 = vmatpush1.bf16.msra.mxu1 %v3781_v16  ;;  %v3822_v43 = vld [vmem:[%s4547_s6 + $0x140] ss:$16 sps:$4 sm:$0xff]   ;;  %v3823_v44 = vld [vmem:[%s4547_s6 + $0x148] ss:$16 sps:$4 sm:$0xff]   ;;  %v3824_v45 = vld [vmem:[%s4547_s6 + $0x164] ss:$16 sps:$4 sm:$0xff]  }
  0xe3   : > { %1096 = vmatprep.subr.bf16.mxu0 %v3782_v17  ;;  %1322 = vmatprep.subr.bf16.mxu1 %v3784_v18  ;;  %v3826_v46 = vld [vmem:[%s4547_s6 + $0x16c] ss:$16 sps:$4 sm:$0xff]   ;;  %v3828_v48 = vld [vmem:[%s4547_s6 + $0x160] ss:$16 sps:$4 sm:$0xff]   ;;  %v3829_v50 = vld [vmem:[%s4547_s6 + $0x168] ss:$16 sps:$4 sm:$0xff]  }
  0xe4   : > { %v419_v47 = vld [vmem:[#allocation3 + $0x8] sm:$0xff]  ;;  %v422_v49 = vld [vmem:[#allocation3 + $0x20] sm:$0xff]  ;;  %v421_v5 = vld [vmem:[#allocation3 + $0x18] sm:$0xff]  ;;  %s5115_s26 = sld [smem:[#allocation18_spill]] }
  0xe5   : > { %v467_v51 = vpack.c.bf16 %v422_v49, %v419_v47  ;;  %v3830_v52 = vld [vmem:[%s4547_s6 + $0x184] ss:$16 sps:$4 sm:$0xff]   ;;  %v3832_v53 = vld [vmem:[%s4547_s6 + $0x18c] ss:$16 sps:$4 sm:$0xff]   ;;  %v3834_v54 = vld [vmem:[%s4547_s6 + $0x180] ss:$16 sps:$4 sm:$0xff]  }
  0xe6   : > { %1097 = vmatpush1.bf16.msra.mxu0 %v3786_v19  ;;  %1323 = vmatpush1.bf16.msra.mxu1 %v3787_v20  ;;  %v3835_v55 = vld [vmem:[%s4547_s6 + $0x188] ss:$16 sps:$4 sm:$0xff]   ;;  %v3836_v56 = vld [vmem:[%s4547_s6 + $0x1a4] ss:$16 sps:$4 sm:$0xff]   ;;  %v3838_v57 = vld [vmem:[%s4547_s6 + $0x1ac] ss:$16 sps:$4 sm:$0xff]  }
  0xe7   : > { %1098 = vmatprep.subr.bf16.mxu0 %v3788_v21  ;;  %1324 = vmatprep.subr.bf16.mxu1 %v3790_v22  ;;  %v3840_v58 = vld [vmem:[%s4547_s6 + $0x1a0] ss:$16 sps:$4 sm:$0xff]   ;;  %v3841_v59 = vld [vmem:[%s4547_s6 + $0x1a8] ss:$16 sps:$4 sm:$0xff]   ;;  %v3842_v60 = vld [vmem:[%s4547_s6 + $0x1c4] ss:$16 sps:$4 sm:$0xff]  }
  0xe8   : > { %1120 = vmatprep.mubr.bf16.mxu0 %v467_v51  ;;  %1346 = vmatprep.mubr.bf16.mxu1 %v467_v51  ;;  %v3844_v61 = vld [vmem:[%s4547_s6 + $0x1cc] ss:$16 sps:$4 sm:$0xff]   ;;  %v3846_v62 = vld [vmem:[%s4547_s6 + $0x1c0] ss:$16 sps:$4 sm:$0xff]   ;;  %v3847_v63 = vld [vmem:[%s4547_s6 + $0x1c8] ss:$16 sps:$4 sm:$0xff]  }
  0xe9   : > { %v3848_v0 = vld [vmem:[%s4547_s6 + $0x1e4] ss:$16 sps:$4 sm:$0xff]   ;;  %v3850_v1 = vld [vmem:[%s4547_s6 + $0x1ec] ss:$16 sps:$4 sm:$0xff]   ;;  %v3852_v2 = vld [vmem:[%s4547_s6 + $0x1e0] ss:$16 sps:$4 sm:$0xff]  }
  0xea   : > { %1099 = vmatpush1.bf16.msra.mxu0 %v3792_v23  ;;  %1325 = vmatpush1.bf16.msra.mxu1 %v3793_v24  ;;  %v3853_v3 = vld [vmem:[%s4547_s6 + $0x1e8] ss:$16 sps:$4 sm:$0xff]   ;;  %v418_v4 = vld [vmem:[#allocation3] sm:$0xff]  ;;  %v428_v8 = vld [vmem:[#allocation3 + $0x50] sm:$0xff]  ;;  %p3355_p12 = scmp.ne.s32.totalorder %s5115_s26, 2 }
  0xeb   : > { %1100 = vmatprep.subr.bf16.mxu0 %v3794_v25  ;;  %1326 = vmatprep.subr.bf16.mxu1 %v3796_v26  ;;  %v3856_v6 = vld [vmem:[%s4547_s6 + $0x204] ss:$16 sps:$4 sm:$0xff]   ;;  %v425_v7 = vld [vmem:[#allocation3 + $0x38] sm:$0xff]  ;;  %v466_v10 = vpack.c.bf16 %v421_v5, %v418_v4  ;;  %v3854_v11 = vld [vmem:[%s4547_s6 + $0x200] ss:$16 sps:$4 sm:$0xff]  }
  0xec   : > { %v3871_v9 = vld [vmem:[%s4547_s6 + $0x20c] ss:$16 sps:$4 sm:$0xff]   ;;  %v470_v12 = vpack.c.bf16 %v428_v8, %v425_v7  ;;  %v3859_v13 = vld [vmem:[%s4547_s6 + $0x224] ss:$16 sps:$4 sm:$0xff]   ;;  %v3869_v15 = vld [vmem:[%s4547_s6 + $0x208] ss:$16 sps:$4 sm:$0xff]  }
  0xed   : > { %v424_v14 = vld [vmem:[#allocation3 + $0x30] sm:$0xff]  ;;  %v427_v16 = vld [vmem:[#allocation3 + $0x48] sm:$0xff]  ;;  %v434_v20 = vld [vmem:[#allocation3 + $0x80] sm:$0xff] }
  0xee   : > { %1101 = vmatpush1.bf16.msra.mxu0 %v3798_v27  ;;  %1327 = vmatpush1.bf16.msra.mxu1 %v3799_v28  ;;  %v3874_v17 = vld [vmem:[%s4547_s6 + $0x22c] ss:$16 sps:$4 sm:$0xff]   ;;  %v3857_v18 = vld [vmem:[%s4547_s6 + $0x220] ss:$16 sps:$4 sm:$0xff]   ;;  %v3862_v21 = vld [vmem:[%s4547_s6 + $0x244] ss:$16 sps:$4 sm:$0xff]   ;;  %v469_v23 = vpack.c.bf16 %v427_v16, %v424_v14 }
  0xef   : > { %1102 = vmatprep.subr.bf16.mxu0 %v3800_v29  ;;  %1328 = vmatprep.subr.bf16.mxu1 %v3802_v30  ;;  %v431_v19 = vld [vmem:[#allocation3 + $0x68] sm:$0xff]  ;;  %v3860_v25 = vld [vmem:[%s4547_s6 + $0x240] ss:$16 sps:$4 sm:$0xff]   ;;  %v3865_v27 = vld [vmem:[%s4547_s6 + $0x264] ss:$16 sps:$4 sm:$0xff]  }
  0xf0   : > { %v3872_v22 = vld [vmem:[%s4547_s6 + $0x228] ss:$16 sps:$4 sm:$0xff]   ;;  %v473_v24 = vpack.c.bf16 %v434_v20, %v431_v19  ;;  %v3880_v26 = vld [vmem:[%s4547_s6 + $0x24c] ss:$16 sps:$4 sm:$0xff]   ;;  %v430_v30 = vld [vmem:[#allocation3 + $0x60] sm:$0xff] }
  0xf1   : > { %v3878_v28 = vld [vmem:[%s4547_s6 + $0x248] ss:$16 sps:$4 sm:$0xff]   ;;  %v3883_v29 = vld [vmem:[%s4547_s6 + $0x26c] ss:$16 sps:$4 sm:$0xff]   ;;  %v446_v47 = vld [vmem:[#allocation3 + $0xe0] sm:$0xff] }
  0xf2   : > { %1103 = vmatpush1.bf16.msra.mxu0 %v3804_v31  ;;  %1329 = vmatpush1.bf16.msra.mxu1 %v3805_v32  ;;  %v433_v31 = vld [vmem:[#allocation3 + $0x78] sm:$0xff]  ;;  %v3886_v49 = vld [vmem:[%s4547_s6 + $0x2c4] ss:$16 sps:$4 sm:$0xff]   ;;  %v451_v5 = vld [vmem:[#allocation3 + $0x108] sm:$0xff] }
  0xf3   : > { %1104 = vmatprep.subr.bf16.mxu0 %v3806_v33  ;;  %1330 = vmatprep.subr.bf16.mxu1 %v3808_v34  ;;  %v437_v32 = vld [vmem:[#allocation3 + $0x98] sm:$0xff]  ;;  %v440_v33 = vld [vmem:[#allocation3 + $0xb0] sm:$0xff]  ;;  %v458_v7 = vld [vmem:[#allocation3 + $0x140] sm:$0xff] }
  0xf4   : > { %v3863_v34 = vld [vmem:[%s4547_s6 + $0x260] ss:$16 sps:$4 sm:$0xff]   ;;  %v423_v20 = vld [vmem:[#allocation3 + $0x28] sm:$0xff] }
  0xf5   : > { %v448_v4 = vld [vmem:[#allocation3 + $0xf0] sm:$0xff] }
  0xf6   : > { %1105 = vmatpush1.bf16.msra.mxu0 %v3810_v35  ;;  %1331 = vmatpush1.bf16.msra.mxu1 %v3811_v36  ;;  %v3868_v35 = vld [vmem:[%s4547_s6 + $0x284] ss:$16 sps:$4 sm:$0xff]   ;;  %v3881_v36 = vld [vmem:[%s4547_s6 + $0x268] ss:$16 sps:$4 sm:$0xff]   ;;  %v481_v8 = vpack.c.bf16 %v451_v5, %v448_v4  ;;  %v3939_v4 = vld [vmem:[%s4556_s14 + $0xd8] ss:$12 sps:$4 sm:$0xff]  }
  0xf7   : > { %1106 = vmatprep.subr.bf16.mxu0 %v3812_v37  ;;  %1332 = vmatprep.subr.bf16.mxu1 %v3814_v38  ;;  %v472_v37 = vpack.c.bf16 %v433_v31, %v430_v30  ;;  %v3866_v38 = vld [vmem:[%s4547_s6 + $0x280] ss:$16 sps:$4 sm:$0xff]   ;;  %v3914_v30 = vld [vmem:[%s4556_s14 + $0x20] ss:$12 sps:$4 sm:$0xff]  }
  0xf8   : > { %v460_v16 = vld [vmem:[#allocation3 + $0x150] sm:$0xff]  ;;  %v3912_v31 = vld [vmem:[%s4556_s14 + $0x34] ss:$12 sps:$4 sm:$0xff]  }
  0xf9   : > { %v420_v19 = vld [vmem:[#allocation3 + $0x10] sm:$0xff]  ;;  %v3944_v5 = vld [vmem:[%s4556_s14 + $0xf4] ss:$12 sps:$4 sm:$0xff]  }
  0xfa   : > { %1107 = vmatpush1.bf16.msra.mxu0 %v3816_v39  ;;  %1333 = vmatpush1.bf16.msra.mxu1 %v3817_v40  ;;  %v476_v39 = vpack.c.bf16 %v440_v33, %v437_v32  ;;  %v3877_v40 = vld [vmem:[%s4547_s6 + $0x2a4] ss:$16 sps:$4 sm:$0xff]   ;;  %v3921_v32 = vld [vmem:[%s4556_s14 + $0xf8] ss:$12 sps:$4 sm:$0xff]  }
  0xfb   : > { %1108 = vmatprep.subr.bf16.mxu0 %v3818_v41  ;;  %1334 = vmatprep.subr.bf16.mxu1 %v3820_v42  ;;  %v3889_v41 = vld [vmem:[%s4547_s6 + $0x28c] ss:$16 sps:$4 sm:$0xff]   ;;  %v436_v42 = vld [vmem:[#allocation3 + $0x90] sm:$0xff] }
  0xfe   : > { %1109 = vmatpush1.bf16.msra.mxu0 %v3822_v43  ;;  %1335 = vmatpush1.bf16.msra.mxu1 %v3823_v44  ;;  %v439_v43 = vld [vmem:[#allocation3 + $0xa8] sm:$0xff] }
  0xff   : > { %1110 = vmatprep.subr.bf16.mxu0 %v3824_v45  ;;  %1336 = vmatprep.subr.bf16.mxu1 %v3826_v46  ;;  %v3887_v44 = vld [vmem:[%s4547_s6 + $0x288] ss:$16 sps:$4 sm:$0xff]   ;;  %v3892_v45 = vld [vmem:[%s4547_s6 + $0x2ac] ss:$16 sps:$4 sm:$0xff]   ;;  %v475_v51 = vpack.c.bf16 %v439_v43, %v436_v42 }
 0x100   : > { %v443_v46 = vld [vmem:[#allocation3 + $0xc8] sm:$0xff]  ;;  %v3937_v43 = vld [vmem:[%s4556_s14 + $0x128] ss:$12 sps:$4 sm:$0xff]  }
 0x101   : > { %v3920_v42 = vld [vmem:[%s4556_s14 + $0x64] ss:$12 sps:$4 sm:$0xff]  }
 0x102   : > { %1111 = vmatpush1.bf16.msra.mxu0 %v3828_v48  ;;  %1337 = vmatpush1.bf16.msra.mxu1 %v3829_v50  ;;  %v3875_v48 = vld [vmem:[%s4547_s6 + $0x2a0] ss:$16 sps:$4 sm:$0xff]   ;;  %v3890_v50 = vld [vmem:[%s4547_s6 + $0x2a8] ss:$16 sps:$4 sm:$0xff]  }
 0x103   : > { %1112 = vmatprep.subr.bf16.mxu0 %v3830_v52  ;;  %1338 = vmatprep.subr.bf16.mxu1 %v3832_v53  ;;  %v479_v52 = vpack.c.bf16 %v446_v47, %v443_v46  ;;  %v3884_v53 = vld [vmem:[%s4547_s6 + $0x2c0] ss:$16 sps:$4 sm:$0xff]  }
 0x104   : > { %v3938_v46 = vld [vmem:[%s4556_s14 + $0x68] ss:$12 sps:$4 sm:$0xff]  }
 0x105   : > { %v3925_v47 = vld [vmem:[%s4556_s14 + $0x7c] ss:$12 sps:$4 sm:$0xff]  }
 0x106   : > { %1113 = vmatpush1.bf16.msra.mxu0 %v3834_v54  ;;  %1339 = vmatpush1.bf16.msra.mxu1 %v3835_v55  ;;  %v3898_v54 = vld [vmem:[%s4547_s6 + $0x2cc] ss:$16 sps:$4 sm:$0xff]   ;;  %v442_v55 = vld [vmem:[#allocation3 + $0xc0] sm:$0xff] }
 0x107   : > { %1114 = vmatprep.subr.bf16.mxu0 %v3836_v56  ;;  %1340 = vmatprep.subr.bf16.mxu1 %v3838_v57  ;;  %v445_v56 = vld [vmem:[#allocation3 + $0xd8] sm:$0xff]  ;;  %v3895_v57 = vld [vmem:[%s4547_s6 + $0x2e4] ss:$16 sps:$4 sm:$0xff]  }
 0x10a   : > { %1115 = vmatpush1.bf16.msra.mxu0 %v3840_v58  ;;  %1341 = vmatpush1.bf16.msra.mxu1 %v3841_v59  ;;  %v3896_v58 = vld [vmem:[%s4547_s6 + $0x2c8] ss:$16 sps:$4 sm:$0xff]  }
 0x10b   : > { %1116 = vmatprep.subr.bf16.mxu0 %v3842_v60  ;;  %1342 = vmatprep.subr.bf16.mxu1 %v3844_v61  ;;  %v449_v59 = vld [vmem:[#allocation3 + $0xf8] sm:$0xff]  ;;  %v452_v61 = vld [vmem:[#allocation3 + $0x110] sm:$0xff] }
 0x10c   : > { %v3901_v60 = vld [vmem:[%s4547_s6 + $0x2ec] ss:$16 sps:$4 sm:$0xff]  }
 0x10e   : > { %1117 = vmatpush1.bf16.msra.mxu0 %v3846_v62  ;;  %1343 = vmatpush1.bf16.msra.mxu1 %v3847_v63  ;;  %v3893_v62 = vld [vmem:[%s4547_s6 + $0x2e0] ss:$16 sps:$4 sm:$0xff]   ;;  %v3899_v63 = vld [vmem:[%s4547_s6 + $0x2e8] ss:$16 sps:$4 sm:$0xff]  }
 0x10f   : > { %1118 = vmatprep.subr.bf16.mxu0 %v3848_v0  ;;  %1344 = vmatprep.subr.bf16.mxu1 %v3850_v1  ;;  %v3904_v0 = vld [vmem:[%s4556_s14 + $0x4] ss:$12 sps:$4 sm:$0xff]   ;;  %v478_v1 = vpack.c.bf16 %v445_v56, %v442_v55 }
 0x110   : > { %v3926_v56 = vld [vmem:[%s4556_s14 + $0x90] ss:$12 sps:$4 sm:$0xff]  }
 0x112   : > { %1119 = vmatpush1.bf16.msra.mxu0 %v3852_v2  ;;  %1345 = vmatpush1.bf16.msra.mxu1 %v3853_v3  ;;  %v482_v2 = vpack.c.bf16 %v452_v61, %v449_v59  ;;  %v3905_v3 = vld [vmem:[%s4556_s14 + $0xc8] ss:$12 sps:$4 sm:$0xff]  }
 0x113   : > { %1201 = vmatprep.subr.bf16.mxu0 %v3856_v6  ;;  %1427 = vmatprep.subr.bf16.mxu1 %v3871_v9  ;;  %v455_v6 = vld [vmem:[#allocation3 + $0x128] sm:$0xff]  ;;  %v444_v59 = vld [vmem:[#allocation3 + $0xd0] sm:$0xff] }
 0x114   : > { %v485_v9 = vpack.c.bf16 %v458_v7, %v455_v6  ;;  %v3931_v61 = vld [vmem:[%s4556_s14 + $0xa8] ss:$12 sps:$4 sm:$0xff]   ;;  %v3942_v7 = vld [vmem:[%s4556_s14 + $0xf0] ss:$12 sps:$4 sm:$0xff]  }
 0x115   : > { %1121 = vmatmul.mubr.bf16.vlgmr.msra.gmra.mrb[0].mxu0 %v466_v10  ;;  %1347 = vmatmul.mubr.bf16.vlgmr.msra.gmra.mrb[0].mxu1 %v466_v10  ;;  %v454_v10 = vld [vmem:[#allocation3 + $0x120] sm:$0xff] }
 0x116   : > { %1202 = vmatpush1.bf16.msra.mxu0 %v3854_v11  ;;  %1130 = vmatprep.mubr.bf16.mxu0 %v470_v12  ;;  %v457_v11 = vld [vmem:[#allocation3 + $0x138] sm:$0xff] }
 0x117   : > { %1356 = vmatprep.mubr.bf16.mxu1 %v470_v12  ;;  %1203 = vmatprep.subr.bf16.mxu0 %v3859_v13  ;;  %v461_v12 = vld [vmem:[#allocation3 + $0x158] sm:$0xff]  ;;  %v464_v13 = vld [vmem:[#allocation3 + $0x170] sm:$0xff]  ;;  %v484_v14 = vpack.c.bf16 %v457_v11, %v454_v10  ;;  %v459_v10 = vld [vmem:[#allocation3 + $0x148] sm:$0xff] }
 0x118   : > { %1428 = vmatpush1.bf16.msra.mxu1 %v3869_v15  ;;  %v488_v15 = vpack.c.bf16 %v464_v13, %v461_v12  ;;  %v3947_v11 = vld [vmem:[%s4556_s14 + $0x108] ss:$12 sps:$4 sm:$0xff]   ;;  %v3952_v12 = vld [vmem:[%s4556_s14 + $0x124] ss:$12 sps:$4 sm:$0xff]  }
 0x119   : > { %1429 = vmatprep.subr.bf16.mxu1 %v3874_v17  ;;  %v463_v17 = vld [vmem:[#allocation3 + $0x168] sm:$0xff] }
 0x11a   : > { %1204 = vmatpush1.bf16.msra.mxu0 %v3857_v18  ;;  %v487_v18 = vpack.c.bf16 %v463_v17, %v460_v16  ;;  %v462_v16 = vld [vmem:[#allocation3 + $0x160] sm:$0xff]  ;;  %v465_v17 = vld [vmem:[#allocation3 + $0x178] sm:$0xff] }
 0x11b   : > { %1205 = vmatprep.subr.bf16.mxu0 %v3862_v21  ;;  %v4283_v21 = vmov 0  }
 0x11c   : > { %1430 = vmatpush1.bf16.msra.mxu1 %v3872_v22  ;;  %v468_v22 = vpack.c.bf16 %v423_v20, %v420_v19  ;;  %v489_v19 = vpack.c.bf16 %v465_v17, %v462_v16  ;;  %v3960_v20 = vld [vmem:[%s4556_s14 + $0x154] ss:$12 sps:$4 sm:$0xff]  }
 0x11d   : > { %1131 = vmatmul.mubr.bf16.gmra.mrb[4].mxu0 %v469_v23  ;;  %1357 = vmatmul.mubr.bf16.gmra.mrb[4].mxu1 %v469_v23  ;;  %v3902_v23 = vld [vmem:[%s4556_s14] ss:$12 sps:$4 sm:$0xff]  }
 0x11e   : > { %1140 = vmatprep.mubr.bf16.mxu0 %v473_v24  ;;  %1366 = vmatprep.mubr.bf16.mxu1 %v473_v24  ;;  %v3906_v24 = vld [vmem:[%s4556_s14 + $0x8] ss:$12 sps:$4 sm:$0xff]  }
 0x11f   : > { %1206 = vmatpush1.bf16.msra.mxu0 %v3860_v25  ;;  %1431 = vmatprep.subr.bf16.mxu1 %v3880_v26  ;;  %v3909_v25 = vld [vmem:[%s4556_s14 + $0x1c] ss:$12 sps:$4 sm:$0xff]   ;;  %v3913_v26 = vld [vmem:[%s4556_s14 + $0xe0] ss:$12 sps:$4 sm:$0xff]  }
 0x120   : > { %1207 = vmatprep.subr.bf16.mxu0 %v3865_v27  ;;  %1432 = vmatpush1.bf16.msra.mxu1 %v3878_v28  ;;  %v426_v27 = vld [vmem:[#allocation3 + $0x40] sm:$0xff]  ;;  %v429_v28 = vld [vmem:[#allocation3 + $0x58] sm:$0xff] }
 0x121   : > { %1433 = vmatprep.subr.bf16.mxu1 %v3883_v29  ;;  %v3907_v29 = vld [vmem:[%s4556_s14 + $0x18] ss:$12 sps:$4 sm:$0xff]   ;;  %v471_v33 = vpack.c.bf16 %v429_v28, %v426_v27  ;;  %v3969_v27 = vld [vmem:[%s4556_s14 + $0x248] ss:$12 sps:$4 sm:$0xff]   ;;  %v588_v28 = vlaneseq }
 0x123   : > { %1208 = vmatpush1.bf16.msra.mxu0 %v3863_v34  ;;  %v3910_v34 = vld [vmem:[%s4556_s14 + $0x30] ss:$12 sps:$4 sm:$0xff]  }
 0x124   : > { %1209 = vmatprep.subr.bf16.mxu0 %v3868_v35  ;;  %1434 = vmatpush1.bf16.msra.mxu1 %v3881_v36  ;;  %v3922_v35 = vld [vmem:[%s4556_s14 + $0x38] ss:$12 sps:$4 sm:$0xff]  }
 0x125   : > { %1141 = vmatmul.mubr.bf16.gmra.mrb[8].mxu0 %v472_v37  ;;  %1367 = vmatmul.mubr.bf16.gmra.mrb[8].mxu1 %v472_v37  ;;  %v3917_v36 = vld [vmem:[%s4556_s14 + $0x4c] ss:$12 sps:$4 sm:$0xff]   ;;  %v3929_v37 = vld [vmem:[%s4556_s14 + $0x110] ss:$12 sps:$4 sm:$0xff]  }
 0x126   : > { %1150 = vmatprep.mubr.bf16.mxu0 %v476_v39  ;;  %1376 = vmatprep.mubr.bf16.mxu1 %v476_v39  ;;  %v435_v39 = vld [vmem:[#allocation3 + $0x88] sm:$0xff] }
 0x127   : > { %1210 = vmatpush1.bf16.msra.mxu0 %v3866_v38  ;;  %1435 = vmatprep.subr.bf16.mxu1 %v3889_v41  ;;  %v432_v38 = vld [vmem:[#allocation3 + $0x70] sm:$0xff]  ;;  %v3930_v41 = vld [vmem:[%s4556_s14 + $0x50] ss:$12 sps:$4 sm:$0xff]  }
 0x128   : > { %1211 = vmatprep.subr.bf16.mxu0 %v3877_v40  ;;  %1436 = vmatpush1.bf16.msra.mxu1 %v3887_v44  ;;  %v3915_v40 = vld [vmem:[%s4556_s14 + $0x48] ss:$12 sps:$4 sm:$0xff]   ;;  %v474_v44 = vpack.c.bf16 %v435_v39, %v432_v38 }
 0x129   : > { %1437 = vmatprep.subr.bf16.mxu1 %v3892_v45  ;;  %v3918_v45 = vld [vmem:[%s4556_s14 + $0x60] ss:$12 sps:$4 sm:$0xff]  }
 0x12b   : > { %1212 = vmatpush1.bf16.msra.mxu0 %v3875_v48  ;;  %v3945_v48 = vld [vmem:[%s4556_s14 + $0x140] ss:$12 sps:$4 sm:$0xff]  }
 0x12c   : > { %1213 = vmatprep.subr.bf16.mxu0 %v3886_v49  ;;  %1438 = vmatpush1.bf16.msra.mxu1 %v3890_v50  ;;  %v438_v49 = vld [vmem:[#allocation3 + $0xa0] sm:$0xff]  ;;  %v441_v50 = vld [vmem:[#allocation3 + $0xb8] sm:$0xff] }
 0x12d   : > { %1151 = vmatmul.mubr.bf16.gmra.mrb[12].mxu0 %v475_v51  ;;  %1377 = vmatmul.mubr.bf16.gmra.mrb[12].mxu1 %v475_v51  ;;  %v3923_v51 = vld [vmem:[%s4556_s14 + $0x78] ss:$12 sps:$4 sm:$0xff]   ;;  %v477_v55 = vpack.c.bf16 %v441_v50, %v438_v49 }
 0x12e   : > { %1160 = vmatprep.mubr.bf16.mxu0 %v479_v52  ;;  %1386 = vmatprep.mubr.bf16.mxu1 %v479_v52  ;;  %v3946_v52 = vld [vmem:[%s4556_s14 + $0x80] ss:$12 sps:$4 sm:$0xff]  }
 0x12f   : > { %1214 = vmatpush1.bf16.msra.mxu0 %v3884_v53  ;;  %1439 = vmatprep.subr.bf16.mxu1 %v3898_v54  ;;  %v3928_v53 = vld [vmem:[%s4556_s14 + $0x94] ss:$12 sps:$4 sm:$0xff]   ;;  %v3953_v54 = vld [vmem:[%s4556_s14 + $0x158] ss:$12 sps:$4 sm:$0xff]  }
 0x130   : > { %1215 = vmatprep.subr.bf16.mxu0 %v3895_v57  ;;  %1440 = vmatpush1.bf16.msra.mxu1 %v3896_v58  ;;  %v3954_v57 = vld [vmem:[%s4556_s14 + $0x98] ss:$12 sps:$4 sm:$0xff]  }
 0x131   : > { %1441 = vmatprep.subr.bf16.mxu1 %v3901_v60  ;;  %v3933_v58 = vld [vmem:[%s4556_s14 + $0xac] ss:$12 sps:$4 sm:$0xff]   ;;  %v447_v60 = vld [vmem:[#allocation3 + $0xe8] sm:$0xff] }
 0x133   : > { %1216 = vmatpush1.bf16.msra.mxu0 %v3893_v62  ;;  %v3936_v62 = vld [vmem:[%s4556_s14 + $0xc4] ss:$12 sps:$4 sm:$0xff]  }
 0x134   : > { %1442 = vmatpush1.bf16.msra.mxu1 %v3899_v63  ;;  %2324 = vmatprep.subr.bf16.mxu0 %v3904_v0  ;;  %v480_v63 = vpack.c.bf16 %v447_v60, %v444_v59  ;;  %v3934_v0 = vld [vmem:[%s4556_s14 + $0xc0] ss:$12 sps:$4 sm:$0xff]  }
 0x135   : > { %1161 = vmatmul.mubr.bf16.gmra.mrb[16].mxu0 %v478_v1  ;;  %1387 = vmatmul.mubr.bf16.gmra.mrb[16].mxu1 %v478_v1  ;;  %v3941_v1 = vld [vmem:[%s4556_s14 + $0xdc] ss:$12 sps:$4 sm:$0xff]  }
 0x136   : > { %1170 = vmatprep.mubr.bf16.mxu0 %v482_v2  ;;  %1396 = vmatprep.mubr.bf16.mxu1 %v482_v2  ;;  %v450_v2 = vld [vmem:[#allocation3 + $0x100] sm:$0xff] }
 0x137   : > { %3362 = vmatprep.subr.bf16.mxu1 %v3905_v3  ;;  %v453_v3 = vld [vmem:[#allocation3 + $0x118] sm:$0xff] }
 0x138   : > { %v483_v6 = vpack.c.bf16 %v453_v3, %v450_v2 }
 0x13d   : > { %1171 = vmatmul.mubr.bf16.gmra.mrb[20].mxu0 %v481_v8  ;;  %1397 = vmatmul.mubr.bf16.gmra.mrb[20].mxu1 %v481_v8  ;;  %v3949_v8 = vld [vmem:[%s4556_s14 + $0x10c] ss:$12 sps:$4 sm:$0xff]  }
 0x13e   : > { %1180 = vmatprep.mubr.bf16.mxu0 %v485_v9  ;;  %1406 = vmatprep.mubr.bf16.mxu1 %v485_v9  ;;  %v456_v9 = vld [vmem:[#allocation3 + $0x130] sm:$0xff] }
 0x13f   : > { %v486_v13 = vpack.c.bf16 %v459_v10, %v456_v9 }
 0x145   : > { %1181 = vmatmul.mubr.bf16.gmra.mrb[24].mxu0 %v484_v14  ;;  %1407 = vmatmul.mubr.bf16.gmra.mrb[24].mxu1 %v484_v14  ;;  %v3950_v14 = vld [vmem:[%s4556_s14 + $0x120] ss:$12 sps:$4 sm:$0xff]  }
 0x146   : > { %1190 = vmatprep.mubr.bf16.mxu0 %v488_v15  ;;  %1416 = vmatprep.mubr.bf16.mxu1 %v488_v15  ;;  %v3957_v15 = vld [vmem:[%s4556_s14 + $0x13c] ss:$12 sps:$4 sm:$0xff]  }
 0x14d   : > { %1191 = vmatmul.mubr.bf16.gmra.mrb[28].mxu0 %v487_v18  ;;  %1417 = vmatmul.mubr.bf16.gmra.mrb[28].mxu1 %v487_v18  ;;  %v3955_v18 = vld [vmem:[%s4556_s14 + $0x138] ss:$12 sps:$4 sm:$0xff]  }
 0x14e   : > { %1233 = vmatprep.mubr.bf16.mxu0 %v4283_v21  ;;  %1459 = vmatprep.mubr.bf16.mxu1 %v4283_v21 }
 0x155   : > { %1234 = vmatmul.mubr.bf16.vlgmr.msra.gmra.mrb[0].mxu0 %v468_v22  ;;  %1460 = vmatmul.mubr.bf16.vlgmr.msra.gmra.mrb[0].mxu1 %v468_v22  ;;  %v3958_v22 = vld [vmem:[%s4556_s14 + $0x150] ss:$12 sps:$4 sm:$0xff]  }
 0x156   : > { %1243 = vmatprep.mubr.bf16.mxu0 %v4283_v21  ;;  %1469 = vmatprep.mubr.bf16.mxu1 %v4283_v21 }
 0x157   : > { %2325 = vmatpush1.bf16.msra.mxu0 %v3902_v23  ;;  %3363 = vmatpush3.bf16.msra.mxu1 %v3906_v24  ;;  %v3961_v23 = vld [vmem:[%s4556_s14 + $0x170] ss:$12 sps:$4 sm:$0xff]  }
 0x158   : > { %2326 = vmatprep.subr.bf16.mxu0 %v3909_v25  ;;  %3364 = vmatprep.subr.bf16.mxu1 %v3913_v26  ;;  %v3962_v24 = vld [vmem:[%s4556_s14 + $0xb0] ss:$12 sps:$4 sm:$0xff]   ;;  %v3963_v25 = vld [vmem:[%s4556_s14 + $0x168] ss:$12 sps:$4 sm:$0xff]  }
 0x159   : > { %v3968_v26 = vld [vmem:[%s4556_s14 + $0x184] ss:$12 sps:$4 sm:$0xff]  }
 0x15b   : > { %2327 = vmatpush1.bf16.msra.mxu0 %v3907_v29  ;;  %3365 = vmatpush3.bf16.msra.mxu1 %v3914_v30  ;;  %v4729_v29 = vshrl.u32 %v588_v28, 7 }
 0x15c   : > { %2328 = vmatprep.subr.bf16.mxu0 %v3912_v31  ;;  %3366 = vmatprep.subr.bf16.mxu1 %v3921_v32  ;;  %v586_v32 = vld [vmem:[%s315_s7] sm:$0xf] }
 0x15d   : > { %1244 = vmatmul.mubr.bf16.gmra.mrb[4].mxu0 %v471_v33  ;;  %1470 = vmatmul.mubr.bf16.gmra.mrb[4].mxu1 %v471_v33  ;;  %v590_v30 = vsub.s32 0, %v4729_v29  ;;  %v598_v31 = vsub.s32 2, %v4729_v29  ;;  %v594_v33 = vsub.s32 1, %v4729_v29 }
 0x15e   : > { %1253 = vmatprep.mubr.bf16.mxu0 %v4283_v21  ;;  %1479 = vmatprep.mubr.bf16.mxu1 %v4283_v21 }
 0x15f   : > { %2329 = vmatpush1.bf16.msra.mxu0 %v3910_v34  ;;  %3367 = vmatpush3.bf16.msra.mxu1 %v3922_v35  ;;  %v602_v34 = vsub.s32 3, %v4729_v29  ;;  %v4739_v35 = vrot.slane %v586_v32, %v590_v30 }
 0x160   : > { %2330 = vmatprep.subr.bf16.mxu0 %v3917_v36  ;;  %3368 = vmatprep.subr.bf16.mxu1 %v3929_v37  ;;  %v4743_v36 = vrot.slane %v586_v32, %v598_v31  ;;  %v4747_v37 = vrot.slane %v586_v32, %v594_v33 }
 0x161   : > { %v4749_v38 = vrot.slane %v586_v32, %v602_v34  ;;  %v3985_v34 = vld [vmem:[%s4556_s14 + $0x278] ss:$12 sps:$4 sm:$0xff]  }
 0x163   : > { %2331 = vmatpush1.bf16.msra.mxu0 %v3915_v40  ;;  %3369 = vmatpush3.bf16.msra.mxu1 %v3930_v41 }
 0x164   : > { %2332 = vmatprep.subr.bf16.mxu0 %v3920_v42  ;;  %3370 = vmatprep.subr.bf16.mxu1 %v3937_v43 }
 0x165   : > { %1254 = vmatmul.mubr.bf16.gmra.mrb[8].mxu0 %v474_v44  ;;  %1480 = vmatmul.mubr.bf16.gmra.mrb[8].mxu1 %v474_v44 }
 0x166   : > { %1263 = vmatprep.mubr.bf16.mxu0 %v4283_v21  ;;  %1489 = vmatprep.mubr.bf16.mxu1 %v4283_v21 }
 0x167   : > { %2333 = vmatpush1.bf16.msra.mxu0 %v3918_v45  ;;  %3371 = vmatpush3.bf16.msra.mxu1 %v3938_v46 }
 0x168   : > { %2334 = vmatprep.subr.bf16.mxu0 %v3925_v47  ;;  %3372 = vmatprep.subr.bf16.mxu1 %v3945_v48 }
 0x16b   : > { %2335 = vmatpush1.bf16.msra.mxu0 %v3923_v51  ;;  %3373 = vmatpush3.bf16.msra.mxu1 %v3946_v52 }
 0x16c   : > { %2336 = vmatprep.subr.bf16.mxu0 %v3928_v53  ;;  %3374 = vmatprep.subr.bf16.mxu1 %v3953_v54 }
 0x16d   : > { %1264 = vmatmul.mubr.bf16.gmra.mrb[12].mxu0 %v477_v55  ;;  %1490 = vmatmul.mubr.bf16.gmra.mrb[12].mxu1 %v477_v55 }
 0x16e   : > { %1273 = vmatprep.mubr.bf16.mxu0 %v4283_v21  ;;  %1499 = vmatprep.mubr.bf16.mxu1 %v4283_v21 }
 0x16f   : > { %2337 = vmatpush1.bf16.msra.mxu0 %v3926_v56  ;;  %3375 = vmatpush3.bf16.msra.mxu1 %v3954_v57 }
 0x170   : > { %2338 = vmatprep.subr.bf16.mxu0 %v3933_v58  ;;  %3376 = vmatprep.subr.bf16.mxu1 %v3961_v23 }
 0x173   : > { %2339 = vmatpush1.bf16.msra.mxu0 %v3931_v61  ;;  %3377 = vmatpush3.bf16.msra.mxu1 %v3962_v24  ;;  %v3976_v24 = vld [vmem:[%s4556_s14 + $0x1b4] ss:$12 sps:$4 sm:$0xff]  }
 0x174   : > { %2340 = vmatprep.subr.bf16.mxu0 %v3936_v62  ;;  %3426 = vmatprep.subr.bf16.mxu1 %v3969_v27 }
 0x175   : > { %1274 = vmatmul.mubr.bf16.gmra.mrb[16].mxu0 %v480_v63  ;;  %1500 = vmatmul.mubr.bf16.gmra.mrb[16].mxu1 %v480_v63 }
 0x176   : > { %1283 = vmatprep.mubr.bf16.mxu0 %v4283_v21  ;;  %1509 = vmatprep.mubr.bf16.mxu1 %v4283_v21 }
 0x177   : > { %2341 = vmatpush1.bf16.msra.mxu0 %v3934_v0 }
 0x178   : > { %2342 = vmatprep.subr.bf16.mxu0 %v3941_v1 }
 0x17b   : > { %2343 = vmatpush1.bf16.msra.mxu0 %v3939_v4 }
 0x17c   : > { %2344 = vmatprep.subr.bf16.mxu0 %v3944_v5  ;;  %v3966_v5 = vld [vmem:[%s4556_s14 + $0x180] ss:$12 sps:$4 sm:$0xff]  }
 0x17d   : > { %1284 = vmatmul.mubr.bf16.gmra.mrb[20].mxu0 %v483_v6  ;;  %1510 = vmatmul.mubr.bf16.gmra.mrb[20].mxu1 %v483_v6  ;;  %v3970_v6 = vld [vmem:[%s4556_s14 + $0x188] ss:$12 sps:$4 sm:$0xff]  }
 0x17e   : > { %1293 = vmatprep.mubr.bf16.mxu0 %v4283_v21  ;;  %1519 = vmatprep.mubr.bf16.mxu1 %v4283_v21 }
 0x17f   : > { %2345 = vmatpush1.bf16.msra.mxu0 %v3942_v7 }
 0x180   : > { %2346 = vmatprep.subr.bf16.mxu0 %v3949_v8 }
 0x183   : > { %2347 = vmatpush1.bf16.msra.mxu0 %v3947_v11  ;;  %v3973_v11 = vld [vmem:[%s4556_s14 + $0x19c] ss:$12 sps:$4 sm:$0xff]  }
 0x184   : > { %2348 = vmatprep.subr.bf16.mxu0 %v3952_v12  ;;  %v3977_v12 = vld [vmem:[%s4556_s14 + $0x260] ss:$12 sps:$4 sm:$0xff]  }
 0x185   : > { %1294 = vmatmul.mubr.bf16.gmra.mrb[24].mxu0 %v486_v13  ;;  %1520 = vmatmul.mubr.bf16.gmra.mrb[24].mxu1 %v486_v13 }
 0x186   : > { %1303 = vmatprep.mubr.bf16.mxu0 %v4283_v21  ;;  %1529 = vmatprep.mubr.bf16.mxu1 %v4283_v21  ;;  %v3965_v21 = vld [vmem:[%s4556_s14 + $0x16c] ss:$12 sps:$4 sm:$0xff]  }
 0x187   : > { %2349 = vmatpush1.bf16.msra.mxu0 %v3950_v14 }
 0x188   : > { %2350 = vmatprep.subr.bf16.mxu0 %v3957_v15 }
 0x18b   : > { %2351 = vmatpush1.bf16.msra.mxu0 %v3955_v18 }
 0x18c   : > { %2352 = vmatprep.subr.bf16.mxu0 %v3960_v20 }
 0x18d   : > { %1304 = vmatmul.mubr.bf16.gmra.mrb[28].mxu0 %v489_v19  ;;  %1530 = vmatmul.mubr.bf16.gmra.mrb[28].mxu1 %v489_v19 }
 0x18f   : > { %2353 = vmatpush1.bf16.msra.mxu0 %v3958_v22 }
 0x190   : > { %2354 = vmatprep.subr.bf16.mxu0 %v3965_v21  ;;  %v3971_v21 = vld [vmem:[%s4556_s14 + $0x198] ss:$12 sps:$4 sm:$0xff]  }
 0x193   : > { %2355 = vmatpush1.bf16.msra.mxu0 %v3963_v25  ;;  %v3978_v25 = vld [vmem:[%s4556_s14 + $0x1a0] ss:$12 sps:$4 sm:$0xff]  }
 0x194   : > { %2437 = vmatprep.subr.bf16.mxu0 %v3968_v26 }
 0x228   : > { %v1235_v39 = vpop.f32.mrb[0].mxu0  ;;  %v1461_v40 = vpop.f32.mrb[0].mxu1 }
 0x229   : > { %v3490_v41 = vadd.f32 %v1235_v39, %v4739_v35  ;;  %v3522_v42 = vadd.f32 %v1461_v40, %v4743_v36  ;;  %v1237_v43 = vpop.f32.mrb[1].mxu0  ;;  %v1463_v44 = vpop.f32.mrb[1].mxu1 }
 0x22a   : > { %v3491_v45 = vadd.f32 %v1237_v43, %v4747_v37  ;;  %v3523_v46 = vadd.f32 %v1463_v44, %v4749_v38  ;;  %v1239_v47 = vpop.f32.mrb[2].mxu0  ;;  %v1465_v48 = vpop.f32.mrb[2].mxu1 }
 0x22b   : > { %v3492_v49 = vadd.f32 %v1239_v47, %v4739_v35  ;;  %v3524_v50 = vadd.f32 %v1465_v48, %v4743_v36  ;;  %v1241_v51 = vpop.f32.mrb[3].mxu0  ;;  %v1467_v52 = vpop.f32.mrb[3].mxu1  ;;  %v1540_v55 = vmax.f32 %v3490_v41, 0.0  ;;  %v1542_v56 = vmax.f32 %v3522_v42, 0.0 }
 0x22c   : > { %v3493_v53 = vadd.f32 %v1241_v51, %v4747_v37  ;;  %v3525_v54 = vadd.f32 %v1467_v52, %v4749_v38  ;;  %v1541_v59 = vmax.f32 %v3491_v45, 0.0  ;;  %v1543_v60 = vmax.f32 %v3523_v46, 0.0 }
 0x22d   : > { %v1544_v57 = vmax.f32 %v3492_v49, 0.0  ;;  %v1546_v58 = vmax.f32 %v3524_v50, 0.0  ;;  %v3974_v49 = vld [vmem:[%s4556_s14 + $0x1b0] ss:$12 sps:$4 sm:$0xff]   ;;  %v3986_v50 = vld [vmem:[%s4556_s14 + $0x1b8] ss:$12 sps:$4 sm:$0xff]  }
 0x22e   : > { %v1545_v61 = vmax.f32 %v3493_v53, 0.0  ;;  %v1547_v62 = vmax.f32 %v3525_v54, 0.0 }
 0x22f   : > { %v1652_v63 = vpack.c.bf16 %v1544_v57, %v1540_v55  ;;  %v4759_v0 = vpack.c.bf16 %v1546_v58, %v1542_v56  ;;  %v3981_v55 = vld [vmem:[%s4556_s14 + $0x1cc] ss:$12 sps:$4 sm:$0xff]   ;;  %v3993_v56 = vld [vmem:[%s4556_s14 + $0x290] ss:$12 sps:$4 sm:$0xff]  }
 0x230   : > { %v1653_v1 = vpack.c.bf16 %v1545_v61, %v1541_v59  ;;  %v4761_v2 = vpack.c.bf16 %v1547_v62, %v1543_v60  ;;  %v1245_v3 = vpop.f32.mrb[4].mxu0  ;;  %v1471_v4 = vpop.f32.mrb[4].mxu1 }
 0x231   : > { %v3494_v7 = vadd.f32 %v1245_v3, %v4739_v35  ;;  %v3526_v8 = vadd.f32 %v1471_v4, %v4743_v36  ;;  %v1247_v9 = vpop.f32.mrb[5].mxu0  ;;  %v1473_v10 = vpop.f32.mrb[5].mxu1 }
 0x232   : > { %v3495_v13 = vadd.f32 %v1247_v9, %v4747_v37  ;;  %v3527_v14 = vadd.f32 %v1473_v10, %v4749_v38  ;;  %v1249_v15 = vpop.f32.mrb[6].mxu0  ;;  %v1475_v16 = vpop.f32.mrb[6].mxu1  ;;  %2356 = vmatprep.mubr.bf16.mxu0 %v1653_v1  ;;  %2582 = vmatprep.mubr.bf16.mxu1 %v1653_v1 }
 0x233   : > { %v3496_v17 = vadd.f32 %v1249_v15, %v4739_v35  ;;  %v3528_v18 = vadd.f32 %v1475_v16, %v4743_v36  ;;  %v1251_v19 = vpop.f32.mrb[7].mxu0  ;;  %v1477_v20 = vpop.f32.mrb[7].mxu1  ;;  %2357 = vmatmul.mubr.bf16.vlgmr.msra.gmra.mrb[32].mxu0 %v1652_v63  ;;  %2583 = vmatmul.mubr.bf16.vlgmr.msra.gmra.mrb[32].mxu1 %v1652_v63  ;;  %v1548_v26 = vmax.f32 %v3494_v7, 0.0  ;;  %v1550_v27 = vmax.f32 %v3526_v8, 0.0  ;;  %v3994_v7 = vld [vmem:[%s4556_s14 + $0x1d0] ss:$12 sps:$4 sm:$0xff]  }
 0x234   : > { %v3497_v22 = vadd.f32 %v1251_v19, %v4747_v37  ;;  %v3529_v23 = vadd.f32 %v1477_v20, %v4749_v38  ;;  %2438 = vmatpush1.bf16.msra.mxu0 %v3966_v5  ;;  %3427 = vmatpush3.bf16.msra.mxu1 %v3970_v6  ;;  %v1549_v39 = vmax.f32 %v3495_v13, 0.0  ;;  %v1551_v40 = vmax.f32 %v3527_v14, 0.0  ;;  %v3979_v5 = vld [vmem:[%s4556_s14 + $0x1c8] ss:$12 sps:$4 sm:$0xff]   ;;  %v3984_v6 = vld [vmem:[%s4556_s14 + $0x1e4] ss:$12 sps:$4 sm:$0xff]  }
 0x235   : > { %v1552_v28 = vmax.f32 %v3496_v17, 0.0  ;;  %v1554_v32 = vmax.f32 %v3528_v18, 0.0  ;;  %2439 = vmatprep.subr.bf16.mxu0 %v3973_v11  ;;  %3428 = vmatprep.subr.bf16.mxu1 %v3977_v12  ;;  %v4001_v12 = vld [vmem:[%s4556_s14 + $0x2a8] ss:$12 sps:$4 sm:$0xff]  }
 0x236   : > { %v1553_v41 = vmax.f32 %v3497_v22, 0.0  ;;  %v1555_v42 = vmax.f32 %v3529_v23, 0.0 }
 0x237   : > { %v1656_v43 = vpack.c.bf16 %v1552_v28, %v1548_v26  ;;  %v4779_v44 = vpack.c.bf16 %v1554_v32, %v1550_v27  ;;  %v3989_v32 = vld [vmem:[%s4556_s14 + $0x1fc] ss:$12 sps:$4 sm:$0xff]  }
 0x238   : > { %v1657_v45 = vpack.c.bf16 %v1553_v41, %v1549_v39  ;;  %v4781_v46 = vpack.c.bf16 %v1555_v42, %v1551_v40  ;;  %v1255_v47 = vpop.f32.mrb[8].mxu0  ;;  %v1481_v48 = vpop.f32.mrb[8].mxu1  ;;  %2440 = vmatpush1.bf16.msra.mxu0 %v3971_v21  ;;  %3429 = vmatpush3.bf16.msra.mxu1 %v3978_v25  ;;  %v3982_v21 = vld [vmem:[%s4556_s14 + $0x1e0] ss:$12 sps:$4 sm:$0xff]  }
 0x239   : > { %v3498_v51 = vadd.f32 %v1255_v47, %v4739_v35  ;;  %v3530_v52 = vadd.f32 %v1481_v48, %v4743_v36  ;;  %v1257_v53 = vpop.f32.mrb[9].mxu0  ;;  %v1483_v54 = vpop.f32.mrb[9].mxu1  ;;  %2441 = vmatprep.subr.bf16.mxu0 %v3976_v24  ;;  %3430 = vmatprep.subr.bf16.mxu1 %v3985_v34  ;;  %v4002_v24 = vld [vmem:[%s4556_s14 + $0x1e8] ss:$12 sps:$4 sm:$0xff]   ;;  %v4009_v34 = vld [vmem:[%s4556_s14 + $0x2c0] ss:$12 sps:$4 sm:$0xff]  }
 0x23a   : > { %v3499_v57 = vadd.f32 %v1257_v53, %v4747_v37  ;;  %v3531_v58 = vadd.f32 %v1483_v54, %v4749_v38  ;;  %v1259_v59 = vpop.f32.mrb[10].mxu0  ;;  %v1485_v60 = vpop.f32.mrb[10].mxu1  ;;  %2366 = vmatprep.mubr.bf16.mxu0 %v1657_v45  ;;  %2590 = vmatprep.mubr.bf16.mxu1 %v1657_v45  ;;  %v4010_v53 = vld [vmem:[%s4556_s14 + $0x200] ss:$12 sps:$4 sm:$0xff]  }
 0x23b   : > { %v3500_v61 = vadd.f32 %v1259_v59, %v4739_v35  ;;  %v3532_v62 = vadd.f32 %v1485_v60, %v4743_v36  ;;  %v1261_v63 = vpop.f32.mrb[11].mxu0  ;;  %v1487_v1 = vpop.f32.mrb[11].mxu1  ;;  %2367 = vmatmul.mubr.bf16.gmra.mrb[36].mxu0 %v1656_v43  ;;  %2591 = vmatmul.mubr.bf16.gmra.mrb[36].mxu1 %v1656_v43  ;;  %v1556_v8 = vmax.f32 %v3498_v51, 0.0  ;;  %v1558_v9 = vmax.f32 %v3530_v52, 0.0  ;;  %v3987_v51 = vld [vmem:[%s4556_s14 + $0x1f8] ss:$12 sps:$4 sm:$0xff]  }
 0x23c   : > { %v3501_v3 = vadd.f32 %v1261_v63, %v4747_v37  ;;  %v3533_v4 = vadd.f32 %v1487_v1, %v4749_v38  ;;  %2442 = vmatpush1.bf16.msra.mxu0 %v3974_v49  ;;  %3431 = vmatpush3.bf16.msra.mxu1 %v3986_v50  ;;  %v1557_v13 = vmax.f32 %v3499_v57, 0.0  ;;  %v1559_v14 = vmax.f32 %v3531_v58, 0.0  ;;  %v3992_v52 = vld [vmem:[%s4556_s14 + $0x214] ss:$12 sps:$4 sm:$0xff]   ;;  %v4017_v58 = vld [vmem:[%s4556_s14 + $0x2d8] ss:$12 sps:$4 sm:$0xff]  }
 0x23d   : > { %v1560_v10 = vmax.f32 %v3500_v61, 0.0  ;;  %v1562_v11 = vmax.f32 %v3532_v62, 0.0  ;;  %2443 = vmatprep.subr.bf16.mxu0 %v3981_v55  ;;  %3432 = vmatprep.subr.bf16.mxu1 %v3993_v56 }
 0x23e   : > { %v1561_v15 = vmax.f32 %v3501_v3, 0.0  ;;  %v1563_v16 = vmax.f32 %v3533_v4, 0.0 }
 0x23f   : > { %v1660_v17 = vpack.c.bf16 %v1560_v10, %v1556_v8  ;;  %v4799_v18 = vpack.c.bf16 %v1562_v11, %v1558_v9  ;;  %v4018_v8 = vld [vmem:[%s4556_s14 + $0x218] ss:$12 sps:$4 sm:$0xff]  }
 0x240   : > { %v1661_v19 = vpack.c.bf16 %v1561_v15, %v1557_v13  ;;  %v4801_v20 = vpack.c.bf16 %v1563_v16, %v1559_v14  ;;  %v1265_v22 = vpop.f32.mrb[12].mxu0  ;;  %v1491_v23 = vpop.f32.mrb[12].mxu1  ;;  %2444 = vmatpush1.bf16.msra.mxu0 %v3979_v5  ;;  %3433 = vmatpush3.bf16.msra.mxu1 %v3994_v7  ;;  %v3990_v7 = vld [vmem:[%s4556_s14 + $0x210] ss:$12 sps:$4 sm:$0xff]   ;;  %v3997_v13 = vld [vmem:[%s4556_s14 + $0x22c] ss:$12 sps:$4 sm:$0xff]  }
 0x241   : > { %v3502_v25 = vadd.f32 %v1265_v22, %v4739_v35  ;;  %v3534_v26 = vadd.f32 %v1491_v23, %v4743_v36  ;;  %v1267_v27 = vpop.f32.mrb[13].mxu0  ;;  %v1493_v28 = vpop.f32.mrb[13].mxu1  ;;  %2445 = vmatprep.subr.bf16.mxu0 %v3984_v6  ;;  %3434 = vmatprep.subr.bf16.mxu1 %v4001_v12  ;;  %v4025_v14 = vld [vmem:[%s4556_s14 + $0x2f0] ss:$12 sps:$4 sm:$0xff]  }
 0x242   : > { %v3503_v39 = vadd.f32 %v1267_v27, %v4747_v37  ;;  %v3535_v40 = vadd.f32 %v1493_v28, %v4749_v38  ;;  %v1269_v41 = vpop.f32.mrb[14].mxu0  ;;  %v1495_v42 = vpop.f32.mrb[14].mxu1  ;;  %2376 = vmatprep.mubr.bf16.mxu0 %v1661_v19  ;;  %2598 = vmatprep.mubr.bf16.mxu1 %v1661_v19  ;;  %v3995_v27 = vld [vmem:[%s4556_s14 + $0x228] ss:$12 sps:$4 sm:$0xff]   ;;  %v4026_v28 = vld [vmem:[%s4556_s14 + $0x230] ss:$12 sps:$4 sm:$0xff]  }
 0x243   : > { %v3504_v43 = vadd.f32 %v1269_v41, %v4739_v35  ;;  %v3536_v45 = vadd.f32 %v1495_v42, %v4743_v36  ;;  %v1271_v47 = vpop.f32.mrb[15].mxu0  ;;  %v1497_v48 = vpop.f32.mrb[15].mxu1  ;;  %2377 = vmatmul.mubr.bf16.gmra.mrb[40].mxu0 %v1660_v17  ;;  %2599 = vmatmul.mubr.bf16.gmra.mrb[40].mxu1 %v1660_v17  ;;  %v1564_v54 = vmax.f32 %v3502_v25, 0.0  ;;  %v1566_v55 = vmax.f32 %v3534_v26, 0.0  ;;  %v4000_v41 = vld [vmem:[%s4556_s14 + $0x244] ss:$12 sps:$4 sm:$0xff]  }
 0x244   : > { %v3505_v49 = vadd.f32 %v1271_v47, %v4747_v37  ;;  %v3537_v50 = vadd.f32 %v1497_v48, %v4749_v38  ;;  %2446 = vmatpush1.bf16.msra.mxu0 %v3982_v21  ;;  %3435 = vmatpush3.bf16.msra.mxu1 %v4002_v24  ;;  %v1565_v59 = vmax.f32 %v3503_v39, 0.0  ;;  %v1567_v60 = vmax.f32 %v3535_v40, 0.0 }
 0x245   : > { %v1568_v56 = vmax.f32 %v3504_v43, 0.0  ;;  %v1570_v57 = vmax.f32 %v3536_v45, 0.0  ;;  %2447 = vmatprep.subr.bf16.mxu0 %v3989_v32  ;;  %3436 = vmatprep.subr.bf16.mxu1 %v4009_v34 }
 0x246   : > { %v1569_v61 = vmax.f32 %v3505_v49, 0.0  ;;  %v1571_v62 = vmax.f32 %v3537_v50, 0.0 }
 0x247   : > { %v1664_v63 = vpack.c.bf16 %v1568_v56, %v1564_v54  ;;  %v4819_v1 = vpack.c.bf16 %v1570_v57, %v1566_v55  ;;  %v3998_v54 = vld [vmem:[%s4556_s14 + $0x240] ss:$12 sps:$4 sm:$0xff]  }
 0x248   : > { %v1665_v3 = vpack.c.bf16 %v1569_v61, %v1565_v59  ;;  %v4821_v4 = vpack.c.bf16 %v1571_v62, %v1567_v60  ;;  %v1275_v5 = vpop.f32.mrb[16].mxu0  ;;  %v1501_v6 = vpop.f32.mrb[16].mxu1  ;;  %2448 = vmatpush1.bf16.msra.mxu0 %v3987_v51  ;;  %3437 = vmatpush3.bf16.msra.mxu1 %v4010_v53  ;;  %v4005_v59 = vld [vmem:[%s4556_s14 + $0x25c] ss:$12 sps:$4 sm:$0xff]  }
 0x249   : > { %v3506_v9 = vadd.f32 %v1275_v5, %v4739_v35  ;;  %v3538_v10 = vadd.f32 %v1501_v6, %v4743_v36  ;;  %v1277_v11 = vpop.f32.mrb[17].mxu0  ;;  %v1503_v12 = vpop.f32.mrb[17].mxu1  ;;  %2449 = vmatprep.subr.bf16.mxu0 %v3992_v52  ;;  %3438 = vmatprep.subr.bf16.mxu1 %v4017_v58 }
 0x24a   : > { %v3507_v15 = vadd.f32 %v1277_v11, %v4747_v37  ;;  %v3539_v16 = vadd.f32 %v1503_v12, %v4749_v38  ;;  %v1279_v17 = vpop.f32.mrb[18].mxu0  ;;  %v1505_v19 = vpop.f32.mrb[18].mxu1  ;;  %2386 = vmatprep.mubr.bf16.mxu0 %v1665_v3  ;;  %2606 = vmatprep.mubr.bf16.mxu1 %v1665_v3 }
 0x24b   : > { %v3508_v22 = vadd.f32 %v1279_v17, %v4739_v35  ;;  %v3540_v23 = vadd.f32 %v1505_v19, %v4743_v36  ;;  %v1281_v21 = vpop.f32.mrb[19].mxu0  ;;  %v1507_v24 = vpop.f32.mrb[19].mxu1  ;;  %2387 = vmatmul.mubr.bf16.gmra.mrb[44].mxu0 %v1664_v63  ;;  %2607 = vmatmul.mubr.bf16.gmra.mrb[44].mxu1 %v1664_v63  ;;  %v1572_v32 = vmax.f32 %v3506_v9, 0.0  ;;  %v1574_v34 = vmax.f32 %v3538_v10, 0.0  ;;  %v4003_v10 = vld [vmem:[%s4556_s14 + $0x258] ss:$12 sps:$4 sm:$0xff]  }
 0x24c   : > { %v3509_v25 = vadd.f32 %v1281_v21, %v4747_v37  ;;  %v3541_v26 = vadd.f32 %v1507_v24, %v4749_v38  ;;  %2450 = vmatpush1.bf16.msra.mxu0 %v3990_v7  ;;  %3439 = vmatpush3.bf16.msra.mxu1 %v4018_v8  ;;  %v1573_v42 = vmax.f32 %v3507_v15, 0.0  ;;  %v1575_v43 = vmax.f32 %v3539_v16, 0.0  ;;  %v4008_v15 = vld [vmem:[%s4556_s14 + $0x274] ss:$12 sps:$4 sm:$0xff]  }
 0x24d   : > { %v1576_v39 = vmax.f32 %v3508_v22, 0.0  ;;  %v1578_v40 = vmax.f32 %v3540_v23, 0.0  ;;  %2451 = vmatprep.subr.bf16.mxu0 %v3997_v13  ;;  %3440 = vmatprep.subr.bf16.mxu1 %v4025_v14 }
 0x24e   : > { %v1577_v45 = vmax.f32 %v3509_v25, 0.0  ;;  %v1579_v47 = vmax.f32 %v3541_v26, 0.0 }
 0x24f   : > { %v1668_v48 = vpack.c.bf16 %v1576_v39, %v1572_v32  ;;  %v4838_v49 = vpack.c.bf16 %v1578_v40, %v1574_v34 }
 0x250   : > { %v1669_v50 = vpack.c.bf16 %v1577_v45, %v1573_v42  ;;  %v4840_v51 = vpack.c.bf16 %v1579_v47, %v1575_v43  ;;  %v1285_v52 = vpop.f32.mrb[20].mxu0  ;;  %v1511_v53 = vpop.f32.mrb[20].mxu1  ;;  %2452 = vmatpush1.bf16.msra.mxu0 %v3995_v27  ;;  %3441 = vmatpush3.bf16.msra.mxu1 %v4026_v28  ;;  %v4006_v28 = vld [vmem:[%s4556_s14 + $0x270] ss:$12 sps:$4 sm:$0xff]  }
 0x251   : > { %v3510_v55 = vadd.f32 %v1285_v52, %v4739_v35  ;;  %v3542_v56 = vadd.f32 %v1511_v53, %v4743_v36  ;;  %v1287_v57 = vpop.f32.mrb[21].mxu0  ;;  %v1513_v58 = vpop.f32.mrb[21].mxu1  ;;  %2453 = vmatprep.subr.bf16.mxu0 %v4000_v41  ;;  %v4013_v41 = vld [vmem:[%s4556_s14 + $0x28c] ss:$12 sps:$4 sm:$0xff]  }
 0x252   : > { %v3511_v60 = vadd.f32 %v1287_v57, %v4747_v37  ;;  %v3543_v61 = vadd.f32 %v1513_v58, %v4749_v38  ;;  %v1289_v62 = vpop.f32.mrb[22].mxu0  ;;  %v1515_v63 = vpop.f32.mrb[22].mxu1  ;;  %2396 = vmatprep.mubr.bf16.mxu0 %v1669_v50  ;;  %2614 = vmatprep.mubr.bf16.mxu1 %v1669_v50 }
 0x253   : > { %v3512_v3 = vadd.f32 %v1289_v62, %v4739_v35  ;;  %v3544_v5 = vadd.f32 %v1515_v63, %v4743_v36  ;;  %v1291_v6 = vpop.f32.mrb[23].mxu0  ;;  %v1517_v7 = vpop.f32.mrb[23].mxu1  ;;  %2397 = vmatmul.mubr.bf16.gmra.mrb[48].mxu0 %v1668_v48  ;;  %2615 = vmatmul.mubr.bf16.gmra.mrb[48].mxu1 %v1668_v48  ;;  %v1580_v11 = vmax.f32 %v3510_v55, 0.0  ;;  %v1582_v12 = vmax.f32 %v3542_v56, 0.0  ;;  %v4011_v56 = vld [vmem:[%s4556_s14 + $0x288] ss:$12 sps:$4 sm:$0xff]  }
 0x254   : > { %v3513_v8 = vadd.f32 %v1291_v6, %v4747_v37  ;;  %v3545_v9 = vadd.f32 %v1517_v7, %v4749_v38  ;;  %2454 = vmatpush1.bf16.msra.mxu0 %v3998_v54  ;;  %v1581_v16 = vmax.f32 %v3511_v60, 0.0  ;;  %v1583_v17 = vmax.f32 %v3543_v61, 0.0  ;;  %v4016_v61 = vld [vmem:[%s4556_s14 + $0x2a4] ss:$12 sps:$4 sm:$0xff]  }
 0x255   : > { %v1584_v13 = vmax.f32 %v3512_v3, 0.0  ;;  %v1586_v14 = vmax.f32 %v3544_v5, 0.0  ;;  %2455 = vmatprep.subr.bf16.mxu0 %v4005_v59 }
 0x256   : > { %v1585_v19 = vmax.f32 %v3513_v8, 0.0  ;;  %v1587_v22 = vmax.f32 %v3545_v9, 0.0 }
 0x257   : > { %v1672_v23 = vpack.c.bf16 %v1584_v13, %v1580_v11  ;;  %v4854_v21 = vpack.c.bf16 %v1586_v14, %v1582_v12  ;;  %v4014_v12 = vld [vmem:[%s4556_s14 + $0x2a0] ss:$12 sps:$4 sm:$0xff]  }
 0x258   : > { %v1673_v24 = vpack.c.bf16 %v1585_v19, %v1581_v16  ;;  %v4856_v25 = vpack.c.bf16 %v1587_v22, %v1583_v17  ;;  %v1295_v26 = vpop.f32.mrb[24].mxu0  ;;  %v1521_v27 = vpop.f32.mrb[24].mxu1  ;;  %2456 = vmatpush1.bf16.msra.mxu0 %v4003_v10  ;;  %v4021_v17 = vld [vmem:[%s4556_s14 + $0x2bc] ss:$12 sps:$4 sm:$0xff]  }
 0x259   : > { %v3514_v32 = vadd.f32 %v1295_v26, %v4739_v35  ;;  %v3546_v34 = vadd.f32 %v1521_v27, %v4743_v36  ;;  %v1297_v39 = vpop.f32.mrb[25].mxu0  ;;  %v1523_v40 = vpop.f32.mrb[25].mxu1  ;;  %2457 = vmatprep.subr.bf16.mxu0 %v4008_v15 }
 0x25a   : > { %v3515_v42 = vadd.f32 %v1297_v39, %v4747_v37  ;;  %v3547_v43 = vadd.f32 %v1523_v40, %v4749_v38  ;;  %v1299_v45 = vpop.f32.mrb[26].mxu0  ;;  %v1525_v47 = vpop.f32.mrb[26].mxu1  ;;  %2406 = vmatprep.mubr.bf16.mxu0 %v1673_v24  ;;  %2622 = vmatprep.mubr.bf16.mxu1 %v1673_v24  ;;  %v4019_v40 = vld [vmem:[%s4556_s14 + $0x2b8] ss:$12 sps:$4 sm:$0xff]  }
 0x25b   : > { %v3516_v48 = vadd.f32 %v1299_v45, %v4739_v35  ;;  %v3548_v50 = vadd.f32 %v1525_v47, %v4743_v36  ;;  %v1301_v52 = vpop.f32.mrb[27].mxu0  ;;  %v1527_v53 = vpop.f32.mrb[27].mxu1  ;;  %2407 = vmatmul.mubr.bf16.gmra.mrb[52].mxu0 %v1672_v23  ;;  %2623 = vmatmul.mubr.bf16.gmra.mrb[52].mxu1 %v1672_v23  ;;  %v1588_v57 = vmax.f32 %v3514_v32, 0.0  ;;  %v1590_v58 = vmax.f32 %v3546_v34, 0.0 }
 0x25c   : > { %v3517_v54 = vadd.f32 %v1301_v52, %v4747_v37  ;;  %v3549_v55 = vadd.f32 %v1527_v53, %v4749_v38  ;;  %2458 = vmatpush1.bf16.msra.mxu0 %v4006_v28  ;;  %v1589_v62 = vmax.f32 %v3515_v42, 0.0  ;;  %v1591_v63 = vmax.f32 %v3547_v43, 0.0 }
 0x25d   : > { %v1592_v59 = vmax.f32 %v3516_v48, 0.0  ;;  %v1594_v60 = vmax.f32 %v3548_v50, 0.0  ;;  %2459 = vmatprep.subr.bf16.mxu0 %v4013_v41 }
 0x25e   : > { %v1593_v3 = vmax.f32 %v3517_v54, 0.0  ;;  %v1595_v5 = vmax.f32 %v3549_v55, 0.0  ;;  %v4029_v55 = vld [vmem:[%s4556_s14 + $0x2ec] ss:$12 sps:$4 sm:$0xff]  }
 0x25f   : > { %v1676_v6 = vpack.c.bf16 %v1592_v59, %v1588_v57  ;;  %v4870_v7 = vpack.c.bf16 %v1594_v60, %v1590_v58 }
 0x260   : > { %v1677_v8 = vpack.c.bf16 %v1593_v3, %v1589_v62  ;;  %v4872_v9 = vpack.c.bf16 %v1595_v5, %v1591_v63  ;;  %v1305_v10 = vpop.f32.mrb[28].mxu0  ;;  %v1531_v11 = vpop.f32.mrb[28].mxu1  ;;  %2460 = vmatpush1.bf16.msra.mxu0 %v4011_v56  ;;  %v4027_v56 = vld [vmem:[%s4556_s14 + $0x2e8] ss:$12 sps:$4 sm:$0xff]  }
 0x261   : > { %v3518_v13 = vadd.f32 %v1305_v10, %v4739_v35  ;;  %v3550_v14 = vadd.f32 %v1531_v11, %v4743_v36  ;;  %v1307_v15 = vpop.f32.mrb[29].mxu0  ;;  %v1533_v16 = vpop.f32.mrb[29].mxu1  ;;  %2461 = vmatprep.subr.bf16.mxu0 %v4016_v61 }
 0x262   : > { %v3519_v19 = vadd.f32 %v1307_v15, %v4747_v37  ;;  %v3551_v22 = vadd.f32 %v1533_v16, %v4749_v38  ;;  %v1309_v23 = vpop.f32.mrb[30].mxu0  ;;  %v1535_v24 = vpop.f32.mrb[30].mxu1  ;;  %2416 = vmatprep.mubr.bf16.mxu0 %v1677_v8  ;;  %2630 = vmatprep.mubr.bf16.mxu1 %v1677_v8 }
 0x263   : > { %v3520_v26 = vadd.f32 %v1309_v23, %v4739_v35  ;;  %v3552_v27 = vadd.f32 %v1535_v24, %v4743_v36  ;;  %v1311_v28 = vpop.f32.mrb[31].mxu0  ;;  %v1537_v32 = vpop.f32.mrb[31].mxu1  ;;  %2417 = vmatmul.mubr.bf16.gmra.mrb[56].mxu0 %v1676_v6  ;;  %2631 = vmatmul.mubr.bf16.gmra.mrb[56].mxu1 %v1676_v6  ;;  %v1596_v41 = vmax.f32 %v3518_v13, 0.0  ;;  %v1598_v42 = vmax.f32 %v3550_v14, 0.0  ;;  %v4024_v35 = vld [vmem:[%s4556_s14 + $0x2d4] ss:$12 sps:$4 sm:$0xff]  }
 0x264   : > { %v3521_v34 = vadd.f32 %v1311_v28, %v4747_v37  ;;  %v3553_v39 = vadd.f32 %v1537_v32, %v4749_v38  ;;  %2462 = vmatpush1.bf16.msra.mxu0 %v4014_v12  ;;  %v1597_v47 = vmax.f32 %v3519_v19, 0.0  ;;  %v1599_v36 = vmax.f32 %v3551_v22, 0.0  ;;  %v4022_v38 = vld [vmem:[%s4556_s14 + $0x2d0] ss:$12 sps:$4 sm:$0xff]  }
 0x265   : > { %v1600_v43 = vmax.f32 %v3520_v26, 0.0  ;;  %v1602_v45 = vmax.f32 %v3552_v27, 0.0  ;;  %2463 = vmatprep.subr.bf16.mxu0 %v4021_v17 }
 0x266   : > { %v1601_v48 = vmax.f32 %v3521_v34, 0.0  ;;  %v1603_v50 = vmax.f32 %v3553_v39, 0.0 }
 0x267   : > { %v1680_v52 = vpack.c.bf16 %v1600_v43, %v1596_v41  ;;  %v1682_v53 = vpack.c.bf16 %v1602_v45, %v1598_v42 }
 0x268   : > { %v1681_v37 = vpack.c.bf16 %v1601_v48, %v1597_v47  ;;  %v1683_v54 = vpack.c.bf16 %v1603_v50, %v1599_v36  ;;  %2464 = vmatpush1.bf16.msra.mxu0 %v4019_v40  ;;  %v1605_v47 = vld [vmem:[#allocation2 + $0x8] sm:$0xff]  ;;  %v1607_v50 = vld [vmem:[#allocation2 + $0x18] sm:$0xff] }
 0x269   : > { %2465 = vmatprep.subr.bf16.mxu0 %v4024_v35  ;;  %v1604_v35 = vld [vmem:[#allocation2] sm:$0xff] }
 0x26a   : > { %2426 = vmatprep.mubr.bf16.mxu0 %v1681_v37  ;;  %2638 = vmatprep.mubr.bf16.mxu1 %v1681_v37 }
 0x26b   : > { %2427 = vmatmul.mubr.bf16.gmra.mrb[60].mxu0 %v1680_v52  ;;  %2639 = vmatmul.mubr.bf16.gmra.mrb[60].mxu1 %v1680_v52 }
 0x26c   : > { %2466 = vmatpush1.bf16.msra.mxu0 %v4022_v38  ;;  %2469 = vmatprep.mubr.bf16.mxu0 %v4761_v2 }
 0x26d   : > { %2679 = vmatprep.mubr.bf16.mxu1 %v4761_v2  ;;  %2467 = vmatprep.subr.bf16.mxu0 %v4029_v55 }
 0x270   : > { %2468 = vmatpush1.bf16.msra.mxu0 %v4027_v56 }
 0x273   : > { %2470 = vmatmul.mubr.bf16.vlgmr.msra.gmra.mrb[32].mxu0 %v4759_v0  ;;  %2680 = vmatmul.mubr.bf16.vlgmr.msra.gmra.mrb[64].mxu1 %v4759_v0 }
 0x274   : > { %2479 = vmatprep.mubr.bf16.mxu0 %v4781_v46  ;;  %2687 = vmatprep.mubr.bf16.mxu1 %v4781_v46 }
 0x27b   : > { %2480 = vmatmul.mubr.bf16.gmra.mrb[36].mxu0 %v4779_v44  ;;  %2688 = vmatmul.mubr.bf16.gmra.mrb[68].mxu1 %v4779_v44 }
 0x27c   : > { %2489 = vmatprep.mubr.bf16.mxu0 %v4801_v20  ;;  %2695 = vmatprep.mubr.bf16.mxu1 %v4801_v20 }
 0x283   : > { %2490 = vmatmul.mubr.bf16.gmra.mrb[40].mxu0 %v4799_v18  ;;  %2696 = vmatmul.mubr.bf16.gmra.mrb[72].mxu1 %v4799_v18 }
 0x284   : > { %2499 = vmatprep.mubr.bf16.mxu0 %v4821_v4  ;;  %2703 = vmatprep.mubr.bf16.mxu1 %v4821_v4 }
 0x28b   : > { %2500 = vmatmul.mubr.bf16.gmra.mrb[44].mxu0 %v4819_v1  ;;  %2704 = vmatmul.mubr.bf16.gmra.mrb[76].mxu1 %v4819_v1 }
 0x28c   : > { %2509 = vmatprep.mubr.bf16.mxu0 %v4840_v51  ;;  %2711 = vmatprep.mubr.bf16.mxu1 %v4840_v51 }
 0x293   : > { %2510 = vmatmul.mubr.bf16.gmra.mrb[48].mxu0 %v4838_v49  ;;  %2712 = vmatmul.mubr.bf16.gmra.mrb[80].mxu1 %v4838_v49 }
 0x294   : > { %2519 = vmatprep.mubr.bf16.mxu0 %v4856_v25  ;;  %2719 = vmatprep.mubr.bf16.mxu1 %v4856_v25 }
 0x29b   : > { %2520 = vmatmul.mubr.bf16.gmra.mrb[52].mxu0 %v4854_v21  ;;  %2720 = vmatmul.mubr.bf16.gmra.mrb[84].mxu1 %v4854_v21 }
 0x29c   : > { %2529 = vmatprep.mubr.bf16.mxu0 %v4872_v9  ;;  %2727 = vmatprep.mubr.bf16.mxu1 %v4872_v9 }
 0x2a3   : > { %2530 = vmatmul.mubr.bf16.gmra.mrb[56].mxu0 %v4870_v7  ;;  %2728 = vmatmul.mubr.bf16.gmra.mrb[88].mxu1 %v4870_v7 }
 0x2a4   : > { %2539 = vmatprep.mubr.bf16.mxu0 %v1683_v54  ;;  %2735 = vmatprep.mubr.bf16.mxu1 %v1683_v54  ;;  %v1608_v54 = vld [vmem:[#allocation2 + $0x20] sm:$0xff] }
 0x2ab   : > { %2540 = vmatmul.mubr.bf16.gmra.mrb[60].mxu0 %v1682_v53  ;;  %2736 = vmatmul.mubr.bf16.gmra.mrb[92].mxu1 %v1682_v53 }
 0x306   : > { %v3378_v0 = vpop.f32.mrb[32].mxu1 }
 0x307   : > { %v3379_v2 = vpop.f32.mrb[33].mxu1 }
 0x308   : > { %v4917_v44 = vadd.f32 %v3379_v2, %v3378_v0  ;;  %v3381_v46 = vpop.f32.mrb[34].mxu1  ;;  %v1606_v2 = vld [vmem:[#allocation2 + $0x10] sm:$0xff] }
 0x309   : > { %v3382_v18 = vpop.f32.mrb[35].mxu1 }
 0x30a   : > { %v4919_v20 = vadd.f32 %v3382_v18, %v3381_v46 }
 0x30e   : > { %v3384_v1 = vpop.f32.mrb[36].mxu1 }
 0x30f   : > { %v3385_v4 = vpop.f32.mrb[37].mxu1 }
 0x310   : > { %v4921_v49 = vadd.f32 %v3385_v4, %v3384_v1  ;;  %v3387_v51 = vpop.f32.mrb[38].mxu1 }
 0x311   : > { %v3388_v21 = vpop.f32.mrb[39].mxu1 }
 0x312   : > { %v4923_v25 = vadd.f32 %v3388_v21, %v3387_v51 }
 0x316   : > { %v3390_v57 = vpop.f32.mrb[40].mxu1 }
 0x317   : > { %v3391_v58 = vpop.f32.mrb[41].mxu1 }
 0x318   : > { %v4925_v59 = vadd.f32 %v3391_v58, %v3390_v57  ;;  %v3393_v60 = vpop.f32.mrb[42].mxu1  ;;  %v1609_v57 = vld [vmem:[#allocation2 + $0x28] sm:$0xff] }
 0x319   : > { %v3394_v61 = vpop.f32.mrb[43].mxu1 }
 0x31a   : > { %v4927_v62 = vadd.f32 %v3394_v61, %v3393_v60  ;;  %v1610_v61 = vld [vmem:[#allocation2 + $0x30] sm:$0xff] }
 0x31e   : > { %v3396_v63 = vpop.f32.mrb[44].mxu1 }
 0x31f   : > { %v3397_v3 = vpop.f32.mrb[45].mxu1 }
 0x320   : > { %v4929_v5 = vadd.f32 %v3397_v3, %v3396_v63  ;;  %v3399_v6 = vpop.f32.mrb[46].mxu1  ;;  %v1611_v63 = vld [vmem:[#allocation2 + $0x38] sm:$0xff] }
 0x321   : > { %v3400_v7 = vpop.f32.mrb[47].mxu1 }
 0x322   : > { %v4931_v8 = vadd.f32 %v3400_v7, %v3399_v6 }
 0x326   : > { %v3402_v9 = vpop.f32.mrb[48].mxu1 }
 0x327   : > { %v3403_v10 = vpop.f32.mrb[49].mxu1 }
 0x328   : > { %v4933_v11 = vadd.f32 %v3403_v10, %v3402_v9  ;;  %v3405_v12 = vpop.f32.mrb[50].mxu1  ;;  %v1613_v9 = vld [vmem:[#allocation2 + $0x48] sm:$0xff] }
 0x329   : > { %v3406_v13 = vpop.f32.mrb[51].mxu1 }
 0x32a   : > { %v4935_v14 = vadd.f32 %v3406_v13, %v3405_v12 }
 0x32e   : > { %v3408_v15 = vpop.f32.mrb[52].mxu1 }
 0x32f   : > { %v3409_v16 = vpop.f32.mrb[53].mxu1 }
 0x330   : > { %v4937_v17 = vadd.f32 %v3409_v16, %v3408_v15  ;;  %v3411_v19 = vpop.f32.mrb[54].mxu1  ;;  %v1614_v15 = vld [vmem:[#allocation2 + $0x50] sm:$0xff] }
 0x331   : > { %v3412_v22 = vpop.f32.mrb[55].mxu1 }
 0x332   : > { %v4939_v23 = vadd.f32 %v3412_v22, %v3411_v19 }
 0x336   : > { %v3414_v24 = vpop.f32.mrb[56].mxu1 }
 0x337   : > { %v3415_v26 = vpop.f32.mrb[57].mxu1 }
 0x338   : > { %v4941_v27 = vadd.f32 %v3415_v26, %v3414_v24  ;;  %v3417_v28 = vpop.f32.mrb[58].mxu1  ;;  %v1612_v24 = vld [vmem:[#allocation2 + $0x40] sm:$0xff] }
 0x339   : > { %v3418_v32 = vpop.f32.mrb[59].mxu1 }
 0x33a   : > { %v4943_v34 = vadd.f32 %v3418_v32, %v3417_v28 }
 0x33e   : > { %v3420_v39 = vpop.f32.mrb[60].mxu1 }
 0x33f   : > { %v3421_v40 = vpop.f32.mrb[61].mxu1 }
 0x340   : > { %v4945_v41 = vadd.f32 %v3421_v40, %v3420_v39  ;;  %v3423_v42 = vpop.f32.mrb[62].mxu1 }
 0x341   : > { %v3424_v43 = vpop.f32.mrb[63].mxu1 }
 0x342   : > { %v4947_v45 = vadd.f32 %v3424_v43, %v3423_v42  ;;  %v1615_v42 = vld [vmem:[#allocation2 + $0x58] sm:$0xff] }
 0x346   : > { %v2471_v36 = vpop.f32.mrb[32].mxu0  ;;  %v3442_v48 = vpop.f32.mrb[64].mxu1 }
 0x347   : > { %v2744_v52 = vadd.f32 %v2471_v36, %v1604_v35  ;;  %v2473_v53 = vpop.f32.mrb[33].mxu0  ;;  %v3443_v37 = vpop.f32.mrb[65].mxu1  ;;  %v1617_v36 = vld [vmem:[#allocation2 + $0x68] sm:$0xff] }
 0x348   : > { %v2745_v38 = vadd.f32 %v2473_v53, %v1605_v47  ;;  %v3444_v55 = vadd.f32 %v3443_v37, %v3442_v48  ;;  %v2475_v56 = vpop.f32.mrb[34].mxu0  ;;  %v3445_v0 = vpop.f32.mrb[66].mxu1  ;;  %v1616_v47 = vld [vmem:[#allocation2 + $0x60] sm:$0xff]  ;;  %v1619_v53 = vld [vmem:[#allocation2 + $0x78] sm:$0xff] }
 0x349   : > { %2792 = vst [vmem:[#allocation2] sm:$0xff] %v2744_v52  ;;  %v2747_v46 = vadd.f32 %v2475_v56, %v1607_v50  ;;  %v2477_v18 = vpop.f32.mrb[35].mxu0  ;;  %v3446_v1 = vpop.f32.mrb[67].mxu1 }
 0x34a   : > { %2793 = vst [vmem:[#allocation2 + $0x8] sm:$0xff] %v2745_v38  ;;  %v2682_v4 = vadd.f32 %v3444_v55, %v4917_v44  ;;  %v2748_v51 = vadd.f32 %v2477_v18, %v1608_v54  ;;  %v3447_v21 = vadd.f32 %v3446_v1, %v3445_v0  ;;  %v1620_v55 = vld [vmem:[#allocation2 + $0x80] sm:$0xff] }
 0x34b   : > { %2795 = vst [vmem:[#allocation2 + $0x18] sm:$0xff] %v2747_v46  ;;  %v1618_v46 = vld [vmem:[#allocation2 + $0x70] sm:$0xff] }
 0x34c   : > { %v2746_v58 = vadd.f32 %v2682_v4, %v1606_v2  ;;  %2796 = vst [vmem:[#allocation2 + $0x20] sm:$0xff] %v2748_v51  ;;  %v2685_v60 = vadd.f32 %v3447_v21, %v4919_v20 }
 0x34e   : > { %2794 = vst [vmem:[#allocation2 + $0x10] sm:$0xff] %v2746_v58  ;;  %v2749_v3 = vadd.f32 %v2685_v60, %v1609_v57  ;;  %v2481_v6 = vpop.f32.mrb[36].mxu0  ;;  %v3448_v7 = vpop.f32.mrb[68].mxu1  ;;  %v1621_v57 = vld [vmem:[#allocation2 + $0x88] sm:$0xff] }
 0x34f   : > { %v2750_v10 = vadd.f32 %v2481_v6, %v1610_v61  ;;  %v2483_v12 = vpop.f32.mrb[37].mxu0  ;;  %v3449_v13 = vpop.f32.mrb[69].mxu1  ;;  %v1622_v61 = vld [vmem:[#allocation2 + $0x90] sm:$0xff] }
 0x350   : > { %2797 = vst [vmem:[#allocation2 + $0x28] sm:$0xff] %v2749_v3  ;;  %v2751_v44 = vadd.f32 %v2483_v12, %v1611_v63  ;;  %v3450_v16 = vadd.f32 %v3449_v13, %v3448_v7  ;;  %v2485_v19 = vpop.f32.mrb[38].mxu0  ;;  %v3451_v22 = vpop.f32.mrb[70].mxu1  ;;  %v1623_v63 = vld [vmem:[#allocation2 + $0x98] sm:$0xff] }
 0x351   : > { %2798 = vst [vmem:[#allocation2 + $0x30] sm:$0xff] %v2750_v10  ;;  %v2753_v26 = vadd.f32 %v2485_v19, %v1613_v9  ;;  %v2487_v20 = vpop.f32.mrb[39].mxu0  ;;  %v3452_v28 = vpop.f32.mrb[71].mxu1  ;;  %v1625_v9 = vld [vmem:[#allocation2 + $0xa8] sm:$0xff] }
 0x352   : > { %2799 = vst [vmem:[#allocation2 + $0x38] sm:$0xff] %v2751_v44  ;;  %v2690_v32 = vadd.f32 %v3450_v16, %v4921_v49  ;;  %v2754_v39 = vadd.f32 %v2487_v20, %v1614_v15  ;;  %v3453_v40 = vadd.f32 %v3452_v28, %v3451_v22  ;;  %v1626_v15 = vld [vmem:[#allocation2 + $0xb0] sm:$0xff]  ;;  %v1624_v22 = vld [vmem:[#allocation2 + $0xa0] sm:$0xff] }
 0x353   : > { %2801 = vst [vmem:[#allocation2 + $0x48] sm:$0xff] %v2753_v26 }
 0x354   : > { %v2752_v43 = vadd.f32 %v2690_v32, %v1612_v24  ;;  %2802 = vst [vmem:[#allocation2 + $0x50] sm:$0xff] %v2754_v39  ;;  %v2693_v35 = vadd.f32 %v3453_v40, %v4923_v25  ;;  %v1627_v39 = vld [vmem:[#allocation2 + $0xb8] sm:$0xff] }
 0x356   : > { %2800 = vst [vmem:[#allocation2 + $0x40] sm:$0xff] %v2752_v43  ;;  %v2755_v48 = vadd.f32 %v2693_v35, %v1615_v42  ;;  %v2491_v50 = vpop.f32.mrb[40].mxu0  ;;  %v3454_v52 = vpop.f32.mrb[72].mxu1  ;;  %v1628_v43 = vld [vmem:[#allocation2 + $0xc0] sm:$0xff]  ;;  %v1629_v35 = vld [vmem:[#allocation2 + $0xc8] sm:$0xff] }
 0x357   : > { %v2756_v37 = vadd.f32 %v2491_v50, %v1616_v47  ;;  %v2493_v54 = vpop.f32.mrb[41].mxu0  ;;  %v3455_v38 = vpop.f32.mrb[73].mxu1  ;;  %v1631_v50 = vld [vmem:[#allocation2 + $0xd8] sm:$0xff] }
 0x358   : > { %2803 = vst [vmem:[#allocation2 + $0x58] sm:$0xff] %v2755_v48  ;;  %v2757_v49 = vadd.f32 %v2493_v54, %v1617_v36  ;;  %v3456_v56 = vadd.f32 %v3455_v38, %v3454_v52  ;;  %v2495_v0 = vpop.f32.mrb[42].mxu0  ;;  %v3457_v2 = vpop.f32.mrb[74].mxu1  ;;  %v1632_v54 = vld [vmem:[#allocation2 + $0xe0] sm:$0xff] }
 0x359   : > { %2804 = vst [vmem:[#allocation2 + $0x60] sm:$0xff] %v2756_v37  ;;  %v2759_v18 = vadd.f32 %v2495_v0, %v1619_v53  ;;  %v2497_v25 = vpop.f32.mrb[43].mxu0  ;;  %v3458_v1 = vpop.f32.mrb[75].mxu1 }
 0x35a   : > { %2805 = vst [vmem:[#allocation2 + $0x68] sm:$0xff] %v2757_v49  ;;  %v2698_v4 = vadd.f32 %v3456_v56, %v4925_v59  ;;  %v2760_v51 = vadd.f32 %v2497_v25, %v1620_v55  ;;  %v3459_v21 = vadd.f32 %v3458_v1, %v3457_v2  ;;  %v1630_v56 = vld [vmem:[#allocation2 + $0xd0] sm:$0xff]  ;;  %v1633_v1 = vld [vmem:[#allocation2 + $0xe8] sm:$0xff] }
 0x35b   : > { %2807 = vst [vmem:[#allocation2 + $0x78] sm:$0xff] %v2759_v18 }
 0x35c   : > { %v2758_v58 = vadd.f32 %v2698_v4, %v1618_v46  ;;  %2808 = vst [vmem:[#allocation2 + $0x80] sm:$0xff] %v2760_v51  ;;  %v2701_v60 = vadd.f32 %v3459_v21, %v4927_v62  ;;  %v1634_v21 = vld [vmem:[#allocation2 + $0xf0] sm:$0xff] }
 0x35e   : > { %2806 = vst [vmem:[#allocation2 + $0x70] sm:$0xff] %v2758_v58  ;;  %v2761_v3 = vadd.f32 %v2701_v60, %v1621_v57  ;;  %v2501_v6 = vpop.f32.mrb[44].mxu0  ;;  %v3460_v7 = vpop.f32.mrb[76].mxu1  ;;  %v1635_v57 = vld [vmem:[#allocation2 + $0xf8] sm:$0xff] }
 0x35f   : > { %v2762_v10 = vadd.f32 %v2501_v6, %v1622_v61  ;;  %v2503_v12 = vpop.f32.mrb[45].mxu0  ;;  %v3461_v13 = vpop.f32.mrb[77].mxu1 }
 0x360   : > { %2809 = vst [vmem:[#allocation2 + $0x88] sm:$0xff] %v2761_v3  ;;  %v2763_v59 = vadd.f32 %v2503_v12, %v1623_v63  ;;  %v3462_v44 = vadd.f32 %v3461_v13, %v3460_v7  ;;  %v2505_v16 = vpop.f32.mrb[46].mxu0  ;;  %v3463_v19 = vpop.f32.mrb[78].mxu1  ;;  %v1637_v63 = vld [vmem:[#allocation2 + $0x108] sm:$0xff] }
 0x361   : > { %2810 = vst [vmem:[#allocation2 + $0x90] sm:$0xff] %v2762_v10  ;;  %v2765_v24 = vadd.f32 %v2505_v16, %v1625_v9  ;;  %v2507_v62 = vpop.f32.mrb[47].mxu0  ;;  %v3464_v26 = vpop.f32.mrb[79].mxu1  ;;  %v1638_v9 = vld [vmem:[#allocation2 + $0x110] sm:$0xff] }
 0x362   : > { %2811 = vst [vmem:[#allocation2 + $0x98] sm:$0xff] %v2763_v59  ;;  %v2706_v20 = vadd.f32 %v3462_v44, %v4929_v5  ;;  %v2766_v28 = vadd.f32 %v2507_v62, %v1626_v15  ;;  %v3465_v32 = vadd.f32 %v3464_v26, %v3463_v19  ;;  %v1636_v15 = vld [vmem:[#allocation2 + $0x100] sm:$0xff] }
 0x363   : > { %2813 = vst [vmem:[#allocation2 + $0xa8] sm:$0xff] %v2765_v24  ;;  %v1639_v24 = vld [vmem:[#allocation2 + $0x118] sm:$0xff] }
 0x364   : > { %v2764_v40 = vadd.f32 %v2706_v20, %v1624_v22  ;;  %2814 = vst [vmem:[#allocation2 + $0xb0] sm:$0xff] %v2766_v28  ;;  %v2709_v42 = vadd.f32 %v3465_v32, %v4931_v8  ;;  %v1640_v20 = vld [vmem:[#allocation2 + $0x120] sm:$0xff]  ;;  %v1641_v28 = vld [vmem:[#allocation2 + $0x128] sm:$0xff] }
 0x366   : > { %2812 = vst [vmem:[#allocation2 + $0xa0] sm:$0xff] %v2764_v40  ;;  %v2767_v47 = vadd.f32 %v2709_v42, %v1627_v39  ;;  %v2511_v36 = vpop.f32.mrb[48].mxu0  ;;  %v3466_v48 = vpop.f32.mrb[80].mxu1  ;;  %v1643_v42 = vld [vmem:[#allocation2 + $0x138] sm:$0xff] }
 0x367   : > { %v2768_v52 = vadd.f32 %v2511_v36, %v1628_v43  ;;  %v2513_v53 = vpop.f32.mrb[49].mxu0  ;;  %v3467_v37 = vpop.f32.mrb[81].mxu1  ;;  %v1644_v36 = vld [vmem:[#allocation2 + $0x140] sm:$0xff] }
 0x368   : > { %2815 = vst [vmem:[#allocation2 + $0xb8] sm:$0xff] %v2767_v47  ;;  %v2769_v5 = vadd.f32 %v2513_v53, %v1629_v35  ;;  %v3468_v38 = vadd.f32 %v3467_v37, %v3466_v48  ;;  %v2515_v55 = vpop.f32.mrb[50].mxu0  ;;  %v3469_v49 = vpop.f32.mrb[82].mxu1  ;;  %v1642_v53 = vld [vmem:[#allocation2 + $0x130] sm:$0xff] }
 0x369   : > { %2816 = vst [vmem:[#allocation2 + $0xc0] sm:$0xff] %v2768_v52  ;;  %v2771_v0 = vadd.f32 %v2515_v55, %v1631_v50  ;;  %v2517_v8 = vpop.f32.mrb[51].mxu0  ;;  %v3470_v2 = vpop.f32.mrb[83].mxu1 }
 0x36a   : > { %2817 = vst [vmem:[#allocation2 + $0xc8] sm:$0xff] %v2769_v5  ;;  %v2714_v46 = vadd.f32 %v3468_v38, %v4933_v11  ;;  %v2772_v18 = vadd.f32 %v2517_v8, %v1632_v54  ;;  %v3471_v25 = vadd.f32 %v3470_v2, %v3469_v49  ;;  %v1645_v49 = vld [vmem:[#allocation2 + $0x148] sm:$0xff]  ;;  %v1646_v8 = vld [vmem:[#allocation2 + $0x150] sm:$0xff]  ;;  %v1647_v2 = vld [vmem:[#allocation2 + $0x158] sm:$0xff] }
 0x36b   : > { %2819 = vst [vmem:[#allocation2 + $0xd8] sm:$0xff] %v2771_v0 }
 0x36c   : > { %v2770_v4 = vadd.f32 %v2714_v46, %v1630_v56  ;;  %2820 = vst [vmem:[#allocation2 + $0xe0] sm:$0xff] %v2772_v18  ;;  %v2717_v51 = vadd.f32 %v3471_v25, %v4935_v14 }
 0x36e   : > { %2818 = vst [vmem:[#allocation2 + $0xd0] sm:$0xff] %v2770_v4  ;;  %v2773_v58 = vadd.f32 %v2717_v51, %v1633_v1  ;;  %v2521_v60 = vpop.f32.mrb[52].mxu0  ;;  %v3472_v61 = vpop.f32.mrb[84].mxu1  ;;  %v1649_v1 = vld [vmem:[#allocation2 + $0x168] sm:$0xff] }
 0x36f   : > { %v2774_v3 = vadd.f32 %v2521_v60, %v1634_v21  ;;  %v2523_v6 = vpop.f32.mrb[53].mxu0  ;;  %v3473_v7 = vpop.f32.mrb[85].mxu1 }
 0x370   : > { %2821 = vst [vmem:[#allocation2 + $0xe8] sm:$0xff] %v2773_v58  ;;  %v2775_v11 = vadd.f32 %v2523_v6, %v1635_v57  ;;  %v3474_v10 = vadd.f32 %v3473_v7, %v3472_v61  ;;  %v2525_v12 = vpop.f32.mrb[54].mxu0  ;;  %v3475_v13 = vpop.f32.mrb[86].mxu1  ;;  %v1650_v57 = vld [vmem:[#allocation2 + $0x170] sm:$0xff] }
 0x371   : > { %2822 = vst [vmem:[#allocation2 + $0xf0] sm:$0xff] %v2774_v3  ;;  %v2777_v59 = vadd.f32 %v2525_v12, %v1637_v63  ;;  %v2527_v14 = vpop.f32.mrb[55].mxu0  ;;  %v3476_v44 = vpop.f32.mrb[87].mxu1  ;;  %v1648_v63 = vld [vmem:[#allocation2 + $0x160] sm:$0xff] }
 0x372   : > { %2823 = vst [vmem:[#allocation2 + $0xf8] sm:$0xff] %v2775_v11  ;;  %v2722_v16 = vadd.f32 %v3474_v10, %v4937_v17  ;;  %v2778_v19 = vadd.f32 %v2527_v14, %v1638_v9  ;;  %v3477_v22 = vadd.f32 %v3476_v44, %v3475_v13  ;;  %v1651_v10 = vld [vmem:[#allocation2 + $0x178] sm:$0xff]  ;;  %v2892_v14 = vld [vmem:[#allocation11] sm:$0x7] (!%p3355_p12) }
 0x373   : > { %2825 = vst [vmem:[#allocation2 + $0x108] sm:$0xff] %v2777_v59  ;;  %v2844_v59 = vld [vmem:[#allocation2] sm:$0xff] (!%p3355_p12)  ;;  %v2845_v44 = vld [vmem:[#allocation2 + $0x8] sm:$0xff] (!%p3355_p12) }
 0x374   : > { %v2776_v62 = vadd.f32 %v2722_v16, %v1636_v15  ;;  %2826 = vst [vmem:[#allocation2 + $0x110] sm:$0xff] %v2778_v19  ;;  %v2725_v26 = vadd.f32 %v3477_v22, %v4939_v23  ;;  %v4972_v16 = vrot.slane (!%p3355_p12), %v2892_v14, %v594_v33  ;;  %v2846_v19 = vld [vmem:[#allocation2 + $0x10] sm:$0xff] (!%p3355_p12)  ;;  %v2847_v22 = vld [vmem:[#allocation2 + $0x18] sm:$0xff] (!%p3355_p12)  ;;  %v2852_v33 = vld [vmem:[#allocation2 + $0x40] sm:$0xff] (!%p3355_p12) }
 0x376   : > { %2824 = vst [vmem:[#allocation2 + $0x100] sm:$0xff] %v2776_v62  ;;  %v2779_v32 = vadd.f32 %v2725_v26, %v1639_v24  ;;  %v2531_v39 = vpop.f32.mrb[56].mxu0  ;;  %v3478_v40 = vpop.f32.mrb[88].mxu1  ;;  %v2848_v24 = vld [vmem:[#allocation2 + $0x20] sm:$0xff] (!%p3355_p12)  ;;  %v2849_v62 = vld [vmem:[#allocation2 + $0x28] sm:$0xff] (!%p3355_p12)  ;;  %v2850_v26 = vld [vmem:[#allocation2 + $0x30] sm:$0xff] (!%p3355_p12) }
 0x377   : > { %v2780_v43 = vadd.f32 %v2531_v39, %v1640_v20  ;;  %v2533_v35 = vpop.f32.mrb[57].mxu0  ;;  %v3479_v47 = vpop.f32.mrb[89].mxu1  ;;  %v2851_v20 = vld [vmem:[#allocation2 + $0x38] sm:$0xff] (!%p3355_p12)  ;;  %v2913_v29 = vadd.f32 (!%p3355_p12), %v4972_v16, %v2848_v24 }
 0x378   : > { %2827 = vst [vmem:[#allocation2 + $0x118] sm:$0xff] %v2779_v32  ;;  %v2781_v17 = vadd.f32 %v2533_v35, %v1641_v28  ;;  %v3480_v48 = vadd.f32 %v3479_v47, %v3478_v40  ;;  %v2535_v50 = vpop.f32.mrb[58].mxu0  ;;  %v3481_v52 = vpop.f32.mrb[90].mxu1  ;;  %v2910_v32 = vadd.f32 (!%p3355_p12), %v4972_v16, %v2845_v44  ;;  %v2853_v40 = vld [vmem:[#allocation2 + $0x48] sm:$0xff] (!%p3355_p12)  ;;  %v2916_v35 = vadd.f32 (!%p3355_p12), %v4972_v16, %v2851_v20  ;;  %v2855_v47 = vld [vmem:[#allocation2 + $0x58] sm:$0xff] (!%p3355_p12) }
 0x379   : > { %2828 = vst [vmem:[#allocation2 + $0x120] sm:$0xff] %v2780_v43  ;;  %v2783_v37 = vadd.f32 %v2535_v50, %v1643_v42  ;;  %v2537_v23 = vpop.f32.mrb[59].mxu0  ;;  %v3482_v54 = vpop.f32.mrb[91].mxu1  ;;  %v2854_v42 = vld [vmem:[#allocation2 + $0x50] sm:$0xff] (!%p3355_p12)  ;;  %2961 = vst [vmem:[#allocation12 + $0x20] sm:$0xff] (!%p3355_p12), %v2913_v29 }
 0x37a   : > { %2829 = vst [vmem:[#allocation2 + $0x128] sm:$0xff] %v2781_v17  ;;  %v2730_v5 = vadd.f32 %v3480_v48, %v4941_v27  ;;  %v2784_v38 = vadd.f32 %v2537_v23, %v1644_v36  ;;  %v3483_v55 = vadd.f32 %v3482_v54, %v3481_v52  ;;  %v2856_v36 = vld [vmem:[#allocation2 + $0x60] sm:$0xff] (!%p3355_p12)  ;;  %v2857_v17 = vld [vmem:[#allocation2 + $0x68] sm:$0xff] (!%p3355_p12)  ;;  %2958 = vst [vmem:[#allocation12 + $0x8] sm:$0xff] (!%p3355_p12), %v2910_v32 }
 0x37b   : > { %2831 = vst [vmem:[#allocation2 + $0x138] sm:$0xff] %v2783_v37  ;;  %v2919_v52 = vadd.f32 (!%p3355_p12), %v4972_v16, %v2854_v42  ;;  %v2858_v37 = vld [vmem:[#allocation2 + $0x70] sm:$0xff] (!%p3355_p12)  ;;  %v2859_v23 = vld [vmem:[#allocation2 + $0x78] sm:$0xff] (!%p3355_p12)  ;;  %v2860_v54 = vld [vmem:[#allocation2 + $0x80] sm:$0xff] (!%p3355_p12) }
 0x37c   : > { %v2782_v56 = vadd.f32 %v2730_v5, %v1642_v53  ;;  %2832 = vst [vmem:[#allocation2 + $0x140] sm:$0xff] %v2784_v38  ;;  %v2733_v0 = vadd.f32 %v3483_v55, %v4943_v34  ;;  %2964 = vst [vmem:[#allocation12 + $0x38] sm:$0xff] (!%p3355_p12), %v2916_v35  ;;  %v2922_v38 = vadd.f32 (!%p3355_p12), %v4972_v16, %v2857_v17  ;;  %v2877_v24 = vld [vmem:[#allocation2 + $0x108] sm:$0xff] (!%p3355_p12) }
 0x37d   : > { %2967 = vst [vmem:[#allocation12 + $0x50] sm:$0xff] (!%p3355_p12), %v2919_v52 }
 0x37e   : > { %2830 = vst [vmem:[#allocation2 + $0x130] sm:$0xff] %v2782_v56  ;;  %v2785_v46 = vadd.f32 %v2733_v0, %v1645_v49  ;;  %v2541_v18 = vpop.f32.mrb[60].mxu0  ;;  %v3484_v25 = vpop.f32.mrb[92].mxu1  ;;  %v2861_v56 = vld [vmem:[#allocation2 + $0x88] sm:$0xff] (!%p3355_p12)  ;;  %v2862_v0 = vld [vmem:[#allocation2 + $0x90] sm:$0xff] (!%p3355_p12)  ;;  %2970 = vst [vmem:[#allocation12 + $0x68] sm:$0xff] (!%p3355_p12), %v2922_v38 }
 0x37f   : > { %v2786_v4 = vadd.f32 %v2541_v18, %v1646_v8  ;;  %v2543_v51 = vpop.f32.mrb[61].mxu0  ;;  %v3485_v21 = vpop.f32.mrb[93].mxu1  ;;  %v2863_v8 = vld [vmem:[#allocation2 + $0x98] sm:$0xff] (!%p3355_p12) }
 0x380   : > { %2833 = vst [vmem:[#allocation2 + $0x148] sm:$0xff] %v2785_v46  ;;  %v2787_v27 = vadd.f32 %v2543_v51, %v1647_v2  ;;  %v3486_v58 = vadd.f32 %v3485_v21, %v3484_v25  ;;  %v2545_v60 = vpop.f32.mrb[62].mxu0  ;;  %v3487_v61 = vpop.f32.mrb[94].mxu1  ;;  %v2925_v2 = vadd.f32 (!%p3355_p12), %v4972_v16, %v2860_v54  ;;  %v2928_v25 = vadd.f32 (!%p3355_p12), %v4972_v16, %v2863_v8  ;;  %v2866_v51 = vld [vmem:[#allocation2 + $0xb0] sm:$0xff] (!%p3355_p12)  ;;  %v2879_v32 = vld [vmem:[#allocation2 + $0x118] sm:$0xff] (!%p3355_p12) }
 0x381   : > { %2834 = vst [vmem:[#allocation2 + $0x150] sm:$0xff] %v2786_v4  ;;  %v2789_v3 = vadd.f32 %v2545_v60, %v1649_v1  ;;  %v2547_v34 = vpop.f32.mrb[63].mxu0  ;;  %v3488_v6 = vpop.f32.mrb[95].mxu1  ;;  %v2864_v1 = vld [vmem:[#allocation2 + $0xa0] sm:$0xff] (!%p3355_p12)  ;;  %v2865_v4 = vld [vmem:[#allocation2 + $0xa8] sm:$0xff] (!%p3355_p12) }
 0x382   : > { %2835 = vst [vmem:[#allocation2 + $0x158] sm:$0xff] %v2787_v27  ;;  %v2738_v7 = vadd.f32 %v3486_v58, %v4945_v41  ;;  %v2790_v9 = vadd.f32 %v2547_v34, %v1650_v57  ;;  %v3489_v11 = vadd.f32 %v3488_v6, %v3487_v61  ;;  %2843 = sbr.rel (%p3355_p12) target bundleno = 924 (0x39c), region = 68  ;;  %v4968_v41 = vrot.slane (!%p3355_p12), %v2892_v14, %v590_v30  ;;  %v2867_v58 = vld [vmem:[#allocation2 + $0xb8] sm:$0xff] (!%p3355_p12)  ;;  %v2868_v60 = vld [vmem:[#allocation2 + $0xc0] sm:$0xff] (!%p3355_p12)  ;;  %v2869_v61 = vld [vmem:[#allocation2 + $0xc8] sm:$0xff] (!%p3355_p12) }
 0x383   : > { %2837 = vst [vmem:[#allocation2 + $0x168] sm:$0xff] %v2789_v3  ;;  %v2931_v27 = vadd.f32 (!%p3355_p12), %v4972_v16, %v2866_v51  ;;  %2973 = vst [vmem:[#allocation12 + $0x80] sm:$0xff] (!%p3355_p12), %v2925_v2  ;;  %v2934_v34 = vadd.f32 (!%p3355_p12), %v4972_v16, %v2869_v61  ;;  %v2870_v6 = vld [vmem:[#allocation2 + $0xd0] sm:$0xff] (!%p3355_p12) }
 0x384   : > { %v2788_v12 = vadd.f32 %v2738_v7, %v1648_v63  ;;  %2838 = vst [vmem:[#allocation2 + $0x170] sm:$0xff] %v2790_v9  ;;  %v2741_v13 = vadd.f32 %v3489_v11, %v4947_v45  ;;  %v4976_v45 = vrot.slane (!%p3355_p12), %v2892_v14, %v598_v31  ;;  %v2909_v28 = vadd.f32 (!%p3355_p12), %v4968_v41, %v2844_v59  ;;  %v2871_v7 = vld [vmem:[#allocation2 + $0xd8] sm:$0xff] (!%p3355_p12)  ;;  %v2872_v9 = vld [vmem:[#allocation2 + $0xe0] sm:$0xff] (!%p3355_p12) }
 0x385   : > { %v2912_v39 = vadd.f32 (!%p3355_p12), %v4968_v41, %v2847_v22  ;;  %v2915_v43 = vadd.f32 (!%p3355_p12), %v4968_v41, %v2850_v26  ;;  %v2918_v50 = vadd.f32 (!%p3355_p12), %v4968_v41, %v2853_v40  ;;  %v2921_v5 = vadd.f32 (!%p3355_p12), %v4968_v41, %v2856_v36  ;;  %2976 = vst [vmem:[#allocation12 + $0x98] sm:$0xff] (!%p3355_p12), %v2928_v25  ;;  %v2875_v59 = vld [vmem:[#allocation2 + $0xf8] sm:$0xff] (!%p3355_p12)  ;;  %v2876_v22 = vld [vmem:[#allocation2 + $0x100] sm:$0xff] (!%p3355_p12)  ;;  %v2882_v29 = vld [vmem:[#allocation2 + $0x130] sm:$0xff] (!%p3355_p12) }
 0x386   : > { %2836 = vst [vmem:[#allocation2 + $0x160] sm:$0xff] %v2788_v12  ;;  %v2791_v15 = vadd.f32 %v2741_v13, %v1651_v10  ;;  %v2911_v30 = vadd.f32 (!%p3355_p12), %v4976_v45, %v2846_v19  ;;  %v2914_v31 = vadd.f32 (!%p3355_p12), %v4976_v45, %v2849_v62  ;;  %2957 = vst [vmem:[#allocation12] sm:$0xff] (!%p3355_p12), %v2909_v28  ;;  %v2873_v13 = vld [vmem:[#allocation2 + $0xe8] sm:$0xff] (!%p3355_p12)  ;;  %v2878_v62 = vld [vmem:[#allocation2 + $0x110] sm:$0xff] (!%p3355_p12) }
 0x387   : > { %2960 = vst [vmem:[#allocation12 + $0x18] sm:$0xff] (!%p3355_p12), %v2912_v39  ;;  %v2917_v48 = vadd.f32 (!%p3355_p12), %v4976_v45, %v2852_v33  ;;  %v2920_v53 = vadd.f32 (!%p3355_p12), %v4976_v45, %v2855_v47  ;;  %2963 = vst [vmem:[#allocation12 + $0x30] sm:$0xff] (!%p3355_p12), %v2915_v43  ;;  %v2923_v55 = vadd.f32 (!%p3355_p12), %v4976_v45, %v2858_v37  ;;  %v2881_v39 = vld [vmem:[#allocation2 + $0x128] sm:$0xff] (!%p3355_p12)  ;;  %v2884_v43 = vld [vmem:[#allocation2 + $0x140] sm:$0xff] (!%p3355_p12) }
 0x388   : > { %2839 = vst [vmem:[#allocation2 + $0x178] sm:$0xff] %v2791_v15  ;;  %2959 = vst [vmem:[#allocation12 + $0x10] sm:$0xff] (!%p3355_p12), %v2911_v30  ;;  %v2924_v49 = vadd.f32 (!%p3355_p12), %v4968_v41, %v2859_v23  ;;  %v2926_v46 = vadd.f32 (!%p3355_p12), %v4976_v45, %v2861_v56  ;;  %v2927_v18 = vadd.f32 (!%p3355_p12), %v4968_v41, %v2862_v0  ;;  %v2874_v15 = vld [vmem:[#allocation2 + $0xf0] sm:$0xff] (!%p3355_p12)  ;;  %v2880_v30 = vld [vmem:[#allocation2 + $0x120] sm:$0xff] (!%p3355_p12) }
 0x389   : > { %2962 = vst [vmem:[#allocation12 + $0x28] sm:$0xff] %v2914_v31  ;;  %2965 = vst [vmem:[#allocation12 + $0x40] sm:$0xff] %v2917_v48  ;;  %v2929_v21 = vadd.f32 %v4976_v45, %v2864_v1  ;;  %v2930_v57 = vadd.f32 %v4968_v41, %v2865_v4  ;;  %v2932_v63 = vadd.f32 %v4976_v45, %v2867_v58  ;;  %v2883_v31 = vld [vmem:[#allocation2 + $0x138] sm:$0xff]  ;;  %v2885_v17 = vld [vmem:[#allocation2 + $0x148] sm:$0xff] }
 0x38a   : > { %2966 = vst [vmem:[#allocation12 + $0x48] sm:$0xff] %v2918_v50  ;;  %2968 = vst [vmem:[#allocation12 + $0x58] sm:$0xff] %v2920_v53  ;;  %v2933_v3 = vadd.f32 %v4968_v41, %v2868_v60  ;;  %v2935_v11 = vadd.f32 %v4976_v45, %v2870_v6  ;;  %v2936_v10 = vadd.f32 %v4968_v41, %v2871_v7  ;;  %v2886_v48 = vld [vmem:[#allocation2 + $0x150] sm:$0xff]  ;;  %v2887_v50 = vld [vmem:[#allocation2 + $0x158] sm:$0xff] }
 0x38b   : > { %2969 = vst [vmem:[#allocation12 + $0x60] sm:$0xff] %v2921_v5  ;;  %2971 = vst [vmem:[#allocation12 + $0x70] sm:$0xff] %v2923_v55  ;;  %v2937_v12 = vadd.f32 %v4972_v16, %v2872_v9  ;;  %v2938_v14 = vadd.f32 %v4976_v45, %v2873_v13  ;;  %v2939_v44 = vadd.f32 %v4968_v41, %v2874_v15  ;;  %v2889_v54 = vld [vmem:[#allocation2 + $0x168] sm:$0xff]  ;;  %v2890_v5 = vld [vmem:[#allocation2 + $0x170] sm:$0xff] }
 0x38c   : > { %2972 = vst [vmem:[#allocation12 + $0x78] sm:$0xff] %v2924_v49  ;;  %2974 = vst [vmem:[#allocation12 + $0x88] sm:$0xff] %v2926_v46  ;;  %v2940_v19 = vadd.f32 %v4972_v16, %v2875_v59  ;;  %v2941_v26 = vadd.f32 %v4976_v45, %v2876_v22  ;;  %v2942_v20 = vadd.f32 %v4968_v41, %v2877_v24 }
 0x38d   : > { %2975 = vst [vmem:[#allocation12 + $0x90] sm:$0xff] %v2927_v18  ;;  %2977 = vst [vmem:[#allocation12 + $0xa0] sm:$0xff] %v2929_v21  ;;  %v2943_v28 = vadd.f32 %v4972_v16, %v2878_v62  ;;  %v2944_v33 = vadd.f32 %v4976_v45, %v2879_v32  ;;  %v2945_v40 = vadd.f32 %v4968_v41, %v2880_v30  ;;  %v2888_v23 = vld [vmem:[#allocation2 + $0x160] sm:$0xff] }
 0x38e   : > { %2978 = vst [vmem:[#allocation12 + $0xa8] sm:$0xff] %v2930_v57  ;;  %2979 = vst [vmem:[#allocation12 + $0xb0] sm:$0xff] %v2931_v27  ;;  %v2946_v42 = vadd.f32 %v4972_v16, %v2881_v39  ;;  %v2947_v35 = vadd.f32 %v4976_v45, %v2882_v29  ;;  %v2948_v47 = vadd.f32 %v4968_v41, %v2883_v31 }
 0x38f   : > { %2980 = vst [vmem:[#allocation12 + $0xb8] sm:$0xff] %v2932_v63  ;;  %2981 = vst [vmem:[#allocation12 + $0xc0] sm:$0xff] %v2933_v3  ;;  %v2949_v36 = vadd.f32 %v4972_v16, %v2884_v43  ;;  %v2950_v52 = vadd.f32 %v4976_v45, %v2885_v17  ;;  %v2951_v53 = vadd.f32 %v4968_v41, %v2886_v48  ;;  %v2891_v56 = vld [vmem:[#allocation2 + $0x178] sm:$0xff] }
 0x390   : > { %2982 = vst [vmem:[#allocation12 + $0xc8] sm:$0xff] %v2934_v34  ;;  %2983 = vst [vmem:[#allocation12 + $0xd0] sm:$0xff] %v2935_v11  ;;  %v2952_v37 = vadd.f32 %v4972_v16, %v2887_v50  ;;  %v2953_v38 = vadd.f32 %v4976_v45, %v2888_v23  ;;  %v2954_v55 = vadd.f32 %v4968_v41, %v2889_v54 }
 0x391   : > { %2984 = vst [vmem:[#allocation12 + $0xd8] sm:$0xff] %v2936_v10  ;;  %2985 = vst [vmem:[#allocation12 + $0xe0] sm:$0xff] %v2937_v12  ;;  %v2955_v49 = vadd.f32 %v4972_v16, %v2890_v5  ;;  %v2956_v0 = vadd.f32 %v4976_v45, %v2891_v56 }
 0x392   : > { %2986 = vst [vmem:[#allocation12 + $0xe8] sm:$0xff] %v2938_v14  ;;  %2987 = vst [vmem:[#allocation12 + $0xf0] sm:$0xff] %v2939_v44 }
 0x393   : > { %2988 = vst [vmem:[#allocation12 + $0xf8] sm:$0xff] %v2940_v19  ;;  %2989 = vst [vmem:[#allocation12 + $0x100] sm:$0xff] %v2941_v26 }
 0x394   : > { %2990 = vst [vmem:[#allocation12 + $0x108] sm:$0xff] %v2942_v20  ;;  %2991 = vst [vmem:[#allocation12 + $0x110] sm:$0xff] %v2943_v28 }
 0x395   : > { %2992 = vst [vmem:[#allocation12 + $0x118] sm:$0xff] %v2944_v33  ;;  %2993 = vst [vmem:[#allocation12 + $0x120] sm:$0xff] %v2945_v40 }
 0x396   : > { %2994 = vst [vmem:[#allocation12 + $0x128] sm:$0xff] %v2946_v42  ;;  %2995 = vst [vmem:[#allocation12 + $0x130] sm:$0xff] %v2947_v35 }
 0x397   : > { %2996 = vst [vmem:[#allocation12 + $0x138] sm:$0xff] %v2948_v47  ;;  %2997 = vst [vmem:[#allocation12 + $0x140] sm:$0xff] %v2949_v36 }
 0x398   : > { %2998 = vst [vmem:[#allocation12 + $0x148] sm:$0xff] %v2950_v52  ;;  %2999 = vst [vmem:[#allocation12 + $0x150] sm:$0xff] %v2951_v53 }
 0x399   : > { %3000 = vst [vmem:[#allocation12 + $0x158] sm:$0xff] %v2952_v37  ;;  %3001 = vst [vmem:[#allocation12 + $0x160] sm:$0xff] %v2953_v38 }
 0x39a   : > { %3002 = vst [vmem:[#allocation12 + $0x168] sm:$0xff] %v2954_v55  ;;  %3003 = vst [vmem:[#allocation12 + $0x170] sm:$0xff] %v2955_v49 }
 0x39b   : > { %3004 = vst [vmem:[#allocation12 + $0x178] sm:$0xff] %v2956_v0 }
 0x39c PF: > { %p3694_p11 = scmp.eq.s32.totalorder %s4346_s24, 2  ;;  %s4284_s30 = smov [#allocation12]  }
 0x39d   : > { %s3015_s9 = sshll.u32 %s4284_s30, 4  ;;  %s3016_s9 = int_to_ptr.vmem [resolvable:$true] %s3015_s9 }
 0x39e   : > { %s4176_s17 = scalar_lea.vmem %s3016_s9, 6144  ;;  %p4183_p6 = scmp.lt.s32.totalorder %s3016_s9, %s3016_s9 }
 0x39f   : > { %p4177_p0 = scmp.ne.s32.totalorder %s3016_s9, %s4176_s17  ;;  %p4184_p8 = scmp.lt.s32.totalorder %s4176_s17, %s4176_s17 }
 0x3a1   : > { %p4178_p7 = pnand %p4177_p0, %p3694_p11  ;;  %p4185_p13 = por %p4184_p8, %p4183_p6 }
 0x3a3   : > { %p4179_p10 = pneg %p4178_p7 }
 0x3a5   : > { %p4186_p3 = pnand %p4185_p13, %p4179_p10 }
 0x3a7   : > { %4189 = shalt.err (!%p4186_p3)
}
 0x3a8   : > { %s5116_s25 = sld [smem:[#allocation23_spill]] }
 0x3ae   : > { %s4190_s8 = scalar_lea.hbm %s5116_s25, 6144 }
 0x3af   : > { %p4191_p1 = scmp.ne.s32.totalorder %s5116_s25, %s4190_s8  ;;  %p4196_p5 = scmp.lt.u32.totalorder %s4190_s8, %s5116_s25 }
 0x3b1   : > { %p4192_p4 = pnand %p4191_p1, %p3694_p11 }
 0x3b3   : > { %p4193_p9 = pneg %p4192_p4 }
 0x3b5   : > { %p4198_p2 = pnand %p4196_p5, %p4193_p9 }
 0x3b7   : > { %4201 = shalt.err (!%p4198_p2)
}
 0x3b8   : > { %s4285_s21 = smov 384   ;;  %s4286_s10 = smov 24  }
 0x3b9   : > { %3669 = dma.vmem_to_hbm [thread:$0]  (%p3694_p11), %s3016_s9, 6144, %s5116_s25, [#allocation5], %s4285_s21, %s4285_s21, %s4286_s10  }
 0x3ba   : > { %4243 = dma.done.wait (%p3694_p11), [#allocation5], 6144  }
 0x3bb   : > { %4245 = vsyncadd (%p3694_p11), [#allocation5], 4294961152 }
 0x3bc PF: > { %s23_s23 = sadd.s32 1, %s4268_s23   ;;  %s5117_s6 = sld [smem:[#allocation20_spill]] }
 0x3bd   : > { %p20_p12 = scmp.ge.s32.totalorder %s23_s23, 5   ;;  %s5118_s27 = sld [smem:[#allocation19_spill]] }
 0x3be   : > { %s5119_s18 = smov %s4252_s19  ;;  %s5120_s19 = smov %s4256_s20 }
 0x3bf   : > { %s5122_s21 = smov %s4264_s22  ;;  %22 = sbr.rel (!%p20_p12) target bundleno = 12 (0xc), region = 120 }
 0x3c2   : > { %s5121_s20 = smov %s5117_s6 }
 0x3c3   : > { %s5123_s22 = smov %s5118_s27 }
 0x3c6   :  { %3031 = vsyncpa [#allocation4], 1 }
 0x3c7   :  { %3033 = vsyncpa [#allocation4 + $0x1], 1 }
 0x3c8   :  { %3034 = vsyncpa [#allocation7], 1 }
 0x3c9   :  { %3036 = vsyncpa [#allocation7 + $0x1], 1 }
 0x3ca   :  { %3037 = vsyncpa [#allocation10], 1 }
 0x3cb   :  { %3039 = vsyncpa [#allocation10 + $0x1], 1 }
 0x3cc   :  { %3040 = vsyncpa [#allocation5], 1 }
 0x3cd   :  { %3042 = vsyncpa [#allocation5 + $0x1], 1 }

</bundles_post_ra>
